<compile_context>
chip_gen: v5e
topology: v5e:2x2
jax: 0.10.0
libtpu: 0.0.40
codegen_flags: <defaults>
</compile_context>

<pallas_src>
import jax
import jax.numpy as jnp
from jax import lax
from jax.experimental import pallas as pl
from jax.experimental.pallas import tpu as pltpu

NEG_SLOPE = 0.2      # GATConv default LeakyReLU negative slope
LANE = 128
SUBLANE = 8


def _round_up(v, m):
    return (v + m - 1) // m * m


# --------------------------------------------------------------------------
# Kernel
# --------------------------------------------------------------------------
def _make_kernel(num_layers, d_pad):
    def kernel(x_ref, adj_ref, q_ref,
               wcat_ref, wsrc_ref, wsl_ref, wl1_ref, wl2_ref,
               bg_ref, bs_ref, bl_ref,
               out_ref):
        f32, bf16 = jnp.float32, jnp.bfloat16
        n = x_ref.shape[0]

        # ---- graph-structure tensors (layer-invariant, computed once) ----
        adj_bf = adj_ref[...]                                    # (N,N) bf16 binary
        adj_f = adj_bf.astype(f32)
        row_id = lax.broadcasted_iota(jnp.int32, (n, n), 0)
        col_id = lax.broadcasted_iota(jnp.int32, (n, n), 1)
        eye = jnp.where(row_id == col_id, 1.0, 0.0).astype(f32)
        gat_mask = jnp.maximum(adj_f, eye)                       # adjacency + self-loops
        deg = jnp.sum(adj_f, axis=-1, keepdims=True)             # (N,1)
        inv_deg = jnp.where(deg > 0.0, pl.reciprocal(deg, approx=True), 0.0)

        x = x_ref[...]                                           # (N, Dp) f32

        for l in range(num_layers):                              # static small count
            x_bf = x.astype(bf16)

            # -- one wide matmul for everything with LHS x --
            xcat = jnp.dot(x_bf, wcat_ref[l], preferred_element_type=f32)
            xw = xcat[:, 0:d_pad]                                # GAT  x @ W
            xsr = xcat[:, d_pad:2 * d_pad]                       # SAGE root term
            xl0 = xcat[:, 2 * d_pad:3 * d_pad]                   # Linear(x) term
            a_dst = xcat[:, 3 * d_pad:3 * d_pad + 1]             # (N,1) att dst logits

            # att src logits as a lane row (1,N); folded vector applied to x
            a_src = lax.dot_general(wsrc_ref[l], x_bf, (((1,), (1,)), ((), ())),
                                    preferred_element_type=f32)

            # ---------------- GATConv(D, D), heads=1 ----------------
            e = a_dst + a_src                                    # (N,N) message j->i
            e = jnp.where(e > 0.0, e, NEG_SLOPE * e)             # LeakyReLU (f32 VPU)
            # mask-multiply softmax: row constant cancels; every row has self-loop
            p = jnp.exp(e - jnp.max(e, axis=-1, keepdims=True)) * gat_mask
            alpha = p * pl.reciprocal(jnp.sum(p, axis=-1, keepdims=True), approx=True)
            gat = jnp.dot(alpha.astype(bf16), xw.astype(bf16),
                          preferred_element_type=f32) + bg_ref[l]

            # ---------------- SAGEConv(D, D), mean aggregation ----------------
            agg = jnp.dot(adj_bf, x_bf, preferred_element_type=f32) * inv_deg
            sage = (jnp.dot(agg.astype(bf16), wsl_ref[l], preferred_element_type=f32)
                    + bs_ref[l] + xsr)

            # (dropout -> identity, see TODO at top)

            # -------- Linear(3D -> D), weight pre-split (no concat) + tanh --------
            z = (xl0
                 + jnp.dot(gat.astype(bf16), wl1_ref[l], preferred_element_type=f32)
                 + jnp.dot(sage.astype(bf16), wl2_ref[l], preferred_element_type=f32)
                 + bl_ref[l])
            x = jnp.tanh(z)

        # ------ decoder: (x[e0] * x[e1]).sum(-1), lane-dense (1, E_q_pad) ------
        x_bf = x.astype(bf16)
        eqp = out_ref.shape[1]
        node_iota = lax.broadcasted_iota(jnp.int32, (n, eqp), 0)
        q = q_ref[...]                                           # (2, EQp) int32
        sel0 = jnp.where(node_iota == q[0:1, :], 1.0, 0.0).astype(bf16)   # (N,EQp)
        sel1 = jnp.where(node_iota == q[1:2, :], 1.0, 0.0).astype(bf16)
        h0 = lax.dot_general(x_bf, sel0, (((0,), (0,)), ((), ())),
                             preferred_element_type=f32)         # (Dp, EQp)
        h1 = lax.dot_general(x_bf, sel1, (((0,), (0,)), ((), ())),
                             preferred_element_type=f32)
        out_ref[...] = jnp.sum(h0 * h1, axis=0, keepdims=True)   # (1, EQp)

    return kernel


# --------------------------------------------------------------------------
# Host-side packing / preprocessing
# --------------------------------------------------------------------------
def init_params(key, in_length, num_layers):
    """Logical (unpadded) parameters, PyTorch-layer-equivalent."""
    D = in_length
    keys = iter(jax.random.split(key, num_layers * 8))
    uni = lambda k, shape, s: jax.random.uniform(k, shape, jnp.float32, -s, s)
    s1, s3 = 1.0 / (D ** 0.5), 1.0 / ((3 * D) ** 0.5)
    cols = {n: [] for n in ["wg", "asrc", "adst", "bg", "wsl", "bs", "wsr", "wl", "bl"]}
    for _ in range(num_layers):
        cols["wg"].append(uni(next(keys), (D, D), s1))       # GAT lin (x @ wg)
        cols["asrc"].append(uni(next(keys), (D,), s1))        # GAT att_src
        cols["adst"].append(uni(next(keys), (D,), s1))        # GAT att_dst
        cols["bg"].append(jnp.zeros((D,), jnp.float32))       # GAT bias
        cols["wsl"].append(uni(next(keys), (D, D), s1))       # SAGE lin_l (neighbors)
        cols["bs"].append(jnp.zeros((D,), jnp.float32))       # SAGE lin_l bias
        cols["wsr"].append(uni(next(keys), (D, D), s1))       # SAGE lin_r (root)
        cols["wl"].append(uni(next(keys), (3 * D, D), s3))    # Linear(3D->D), transposed
        cols["bl"].append(uni(next(keys), (D,), s3))
    return {n: jnp.stack(v, 0) for n, v in cols.items()}


def pack_params(params, d, num_layers):
    """Pad to lane width, fold attention vectors, fuse x-LHS weights, cast bf16."""
    d_pad = _round_up(max(d, LANE), LANE)
    L = num_layers
    wide = 3 * d_pad + LANE
    wcat = jnp.zeros((L, d_pad, wide), jnp.float32)
    wsrc = jnp.zeros((L, 1, d_pad), jnp.float32)
    wsl = jnp.zeros((L, d_pad, d_pad), jnp.float32)
    wl1 = jnp.zeros((L, d_pad, d_pad), jnp.float32)
    wl2 = jnp.zeros((L, d_pad, d_pad), jnp.float32)
    bg = jnp.zeros((L, 1, d_pad), jnp.float32)
    bs = jnp.zeros((L, 1, d_pad), jnp.float32)
    bl = jnp.zeros((L, 1, d_pad), jnp.float32)
    for l in range(L):
        wg = params["wg"][l]
        wl = params["wl"][l]
        wcat = wcat.at[l, :d, 0:d].set(wg)
        wcat = wcat.at[l, :d, d_pad:d_pad + d].set(params["wsr"][l])
        wcat = wcat.at[l, :d, 2 * d_pad:2 * d_pad + d].set(wl[:d, :])
        wcat = wcat.at[l, :d, 3 * d_pad].set(wg @ params["adst"][l])   # folded dst vec
        wsrc = wsrc.at[l, 0, :d].set(wg @ params["asrc"][l])           # folded src vec
        wsl = wsl.at[l, :d, :d].set(params["wsl"][l])
        wl1 = wl1.at[l, :d, :d].set(wl[d:2 * d, :])
        wl2 = wl2.at[l, :d, :d].set(wl[2 * d:3 * d, :])
        bg = bg.at[l, 0, :d].set(params["bg"][l])
        bs = bs.at[l, 0, :d].set(params["bs"][l])
        bl = bl.at[l, 0, :d].set(params["bl"][l])
    bf16 = jnp.bfloat16
    return dict(wcat=wcat.astype(bf16), wsrc=wsrc.astype(bf16), wsl=wsl.astype(bf16),
                wl1=wl1.astype(bf16), wl2=wl2.astype(bf16),
                bg=bg, bs=bs, bl=bl, d_pad=d_pad)


def _preprocess(drug_features, target_features, query_edges,
                all_edges, all_edge_weights, d_pad):
    n_drug = drug_features.shape[0]
    n_real = n_drug + target_features.shape[0]
    n_pad = _round_up(max(n_real, SUBLANE), SUBLANE)
    d = drug_features.shape[1]

    x = jnp.zeros((n_pad, d_pad), jnp.float32)
    x = x.at[:n_drug, :d].set(drug_features.astype(jnp.float32))
    x = x.at[n_drug:n_real, :d].set(target_features.astype(jnp.float32))

    # select_with_weight(): keep edges with sigmoid(w) > 0.5 -> binary adjacency
    keep = (jax.nn.sigmoid(all_edge_weights) > 0.5).astype(jnp.float32)
    src, dst = all_edges[0], all_edges[1]
    adj = jnp.zeros((n_pad, n_pad), jnp.float32).at[dst, src].max(keep)
    adj = adj.astype(jnp.bfloat16)                 # row = target, col = source

    e_q = query_edges.shape[1]
    eq_pad = _round_up(max(e_q, LANE), LANE)
    qidx = jnp.full((2, eq_pad), n_pad, jnp.int32)  # out-of-range pad -> zero gather
    qidx = qidx.at[:, :e_q].set(query_edges.astype(jnp.int32))
    return x, adj, qidx, n_pad, eq_pad


def graph_model_forward(drug_features, target_features, query_edges,
                        all_edges, all_edge_weights, params, num_layers):
    d = drug_features.shape[1]
    packed = pack_params(params, d, num_layers)
    d_pad = packed["d_pad"]
    x, adj, qidx, n_pad, eq_pad = _preprocess(
        drug_features, target_features, query_edges, all_edges, all_edge_weights, d_pad)

    inputs = [x, adj, qidx,
              packed["wcat"], packed["wsrc"], packed["wsl"], packed["wl1"],
              packed["wl2"], packed["bg"], packed["bs"], packed["bl"]]

    def _full(a):
        nd = a.ndim
        return pl.BlockSpec(a.shape, lambda *_: (0,) * nd)

    # crude VMEM budget: N^2 adjacency/masks/softmax temps + x copies + weights
    est = (2 * n_pad * n_pad + 4 * n_pad * n_pad * 4
           + 4 * n_pad * d_pad * 8
           + sum(int(a.size) * a.dtype.itemsize for a in inputs)
           + 4 * d_pad * eq_pad * 2 + 8 * eq_pad)
    vmem_bytes = int(min(max(2 * est, 32 << 20), 64 << 20))

    out = pl.pallas_call(
        _make_kernel(num_layers, d_pad),
        out_shape=jax.ShapeDtypeStruct((1, eq_pad), jnp.float32),
        in_specs=[_full(a) for a in inputs],
        out_specs=pl.BlockSpec((1, eq_pad), lambda *_: (0, 0)),
        compiler_params=pltpu.CompilerParams(vmem_limit_bytes=vmem_bytes),
    )(*inputs)
    return out[0, :query_edges.shape[1]]


# --------------------------------------------------------------------------
# Pure-JAX reference (same math, same bf16 operand rounding) for correctness
# --------------------------------------------------------------------------
def reference_forward(drug_features, target_features, query_edges,
                      all_edges, all_edge_weights, params, num_layers):
    f32, bf16 = jnp.float32, jnp.bfloat16
    mm = lambda a, b: jnp.dot(a.astype(bf16), b.astype(bf16), preferred_element_type=f32)
    n = drug_features.shape[0] + target_features.shape[0]
    d = drug_features.shape[1]
    x = jnp.concatenate([drug_features, target_features], 0).astype(f32)
    keep = (jax.nn.sigmoid(all_edge_weights) > 0.5).astype(f32)
    adj = jnp.zeros((n, n), f32).at[all_edges[1], all_edges[0]].max(keep)
    gat_mask = jnp.maximum(adj, jnp.eye(n, dtype=f32))
    deg = adj.sum(-1, keepdims=True)
    inv_deg = jnp.where(deg > 0, 1.0 / deg, 0.0)
    for l in range(num_layers):
        wg, wl = params["wg"][l], params["wl"][l]
        xw = mm(x, wg)
        a_dst = mm(x, (wg @ params["adst"][l])[:, None])        # (N,1)
        a_src = mm(x, (wg @ params["asrc"][l])[:, None]).T      # (1,N)
        e = a_dst + a_src
        e = jnp.where(e > 0, e, NEG_SLOPE * e)
        p = jnp.exp(e - e.max(-1, keepdims=True)) * gat_mask
        alpha = p / p.sum(-1, keepdims=True)
        gat = mm(alpha, xw) + params["bg"][l]
        agg = mm(adj, x) * inv_deg
        sage = mm(agg, params["wsl"][l]) + params["bs"][l] + mm(x, params["wsr"][l])
        z = mm(x, wl[:d]) + mm(gat, wl[d:2 * d]) + mm(sage, wl[2 * d:]) + params["bl"][l]
        x = jnp.tanh(z)
    h0 = x[query_edges[0]].astype(bf16).astype(f32)
    h1 = x[query_edges[1]].astype(bf16).astype(f32)
    return jnp.sum(h0 * h1, axis=-1)


# --------------------------------------------------------------------------
if __name__ == "__main__":
    in_length = 32
    num_layers = 2
    num_drugs, num_targets = 6, 10
    N = num_drugs + num_targets

    key = jax.random.PRNGKey(0)
    k_d, k_t, k_e1, k_e2, k_e3, k_q, k_p = jax.random.split(key, 7)

    drug_features = jax.random.normal(k_d, (num_drugs, in_length), jnp.float32)
    target_features = jax.random.normal(k_t, (num_targets, in_length), jnp.float32)

    drug_edges = jax.random.randint(k_e1, (2, 10), 0, num_drugs, dtype=jnp.int32)
    target_edges = jax.random.randint(k_e2, (2, 12), num_drugs, N, dtype=jnp.int32)
    tp_src = jax.random.randint(k_e3, (1, 8), 0, num_drugs, dtype=jnp.int32)
    tp_dst = jax.random.randint(jax.random.fold_in(k_e3, 1), (1, 8), num_drugs, N,
                                dtype=jnp.int32)
    train_positive_edges = jnp.concatenate([tp_src, tp_dst], axis=0)
    all_edges = jnp.concatenate([drug_edges, target_edges, train_positive_edges], axis=-1)
    all_edge_weights = jnp.ones((all_edges.shape[1],), jnp.float32)  # nn.Parameter(ones)

    query_edges = jnp.stack([
        jax.random.randint(k_q, (8,), 0, num_drugs, dtype=jnp.int32),
        jax.random.randint(jax.random.fold_in(k_q, 1), (8,), num_drugs, N,
                           dtype=jnp.int32)])

    params = init_params(k_p, in_length, num_layers)

    out = graph_model_forward(drug_features, target_features, query_edges,
                              all_edges, all_edge_weights, params, num_layers)
    jax.block_until_ready(out)

    ref = reference_forward(drug_features, target_features, query_edges,
                            all_edges, all_edge_weights, params, num_layers)

    assert out.shape == (query_edges.shape[1],)
    assert bool(jnp.all(jnp.isfinite(out)))
    # tolerance covers pl.reciprocal(approx=True); bf16 operand rounding is matched
    assert bool(jnp.allclose(out, ref, atol=3e-2, rtol=3e-2)), (out, ref)
    print("KERNEL_OK")
</pallas_src>

<mosaic_0001>
module attributes {stable_mosaic.version = 11 : i64} {
  func.func @kernel(%arg0: memref<16x128xf32, #tpu.memory_space<vmem>>, %arg1: memref<16x16xbf16, #tpu.memory_space<vmem>>, %arg2: memref<2x128xi32, #tpu.memory_space<vmem>>, %arg3: memref<2x128x512xbf16, #tpu.memory_space<vmem>>, %arg4: memref<2x1x128xbf16, #tpu.memory_space<vmem>>, %arg5: memref<2x128x128xbf16, #tpu.memory_space<vmem>>, %arg6: memref<2x128x128xbf16, #tpu.memory_space<vmem>>, %arg7: memref<2x128x128xbf16, #tpu.memory_space<vmem>>, %arg8: memref<2x1x128xf32, #tpu.memory_space<vmem>>, %arg9: memref<2x1x128xf32, #tpu.memory_space<vmem>>, %arg10: memref<2x1x128xf32, #tpu.memory_space<vmem>>, %arg11: memref<1x128xf32, #tpu.memory_space<vmem>>) attributes {dimension_semantics = [], scalar_prefetch = 0 : i64, scratch_operands = 0 : i64, tpu.core_type = #tpu.core_type<tc>} {
    %c0 = arith.constant 0 : index
    %c0_0 = arith.constant 0 : index
    %0 = vector.load %arg1[%c0, %c0_0] : memref<16x16xbf16, #tpu.memory_space<vmem>>, vector<16x16xbf16>
    %1 = arith.extf %0 : vector<16x16xbf16> to vector<16x16xf32>
    %2 = tpu.iota {dimensions = array<i32: 0>} : vector<16x16xi32>
    %3 = tpu.iota {dimensions = array<i32: 1>} : vector<16x16xi32>
    %4 = arith.cmpi eq, %2, %3 : vector<16x16xi32>
    %cst = arith.constant 1.000000e+00 : f32
    %cst_1 = arith.constant 0.000000e+00 : f32
    %5 = vector.broadcast %cst : f32 to vector<16x16xf32>
    %6 = vector.broadcast %cst_1 : f32 to vector<16x16xf32>
    %7 = arith.select %4, %5, %6 : vector<16x16xi1>, vector<16x16xf32>
    %8 = arith.maximumf %1, %7 : vector<16x16xf32>
    %cst_2 = arith.constant dense<0.000000e+00> : vector<16xf32>
    %9 = vector.multi_reduction <add>, %1, %cst_2 [1] : vector<16x16xf32> to vector<16xf32>
    %10 = vector.shape_cast %9 : vector<16xf32> to vector<16x1xf32>
    %cst_3 = arith.constant 0.000000e+00 : f32
    %11 = vector.broadcast %cst_3 : f32 to vector<16x1xf32>
    %12 = arith.cmpf ogt, %10, %11 : vector<16x1xf32>
    %13 = tpu.reciprocal %10 {approx = true} : vector<16x1xf32> -> vector<16x1xf32>
    %cst_4 = arith.constant 0.000000e+00 : f32
    %14 = vector.broadcast %cst_4 : f32 to vector<16x1xf32>
    %15 = arith.select %12, %13, %14 : vector<16x1xi1>, vector<16x1xf32>
    %c0_5 = arith.constant 0 : index
    %c0_6 = arith.constant 0 : index
    %16 = vector.load %arg0[%c0_5, %c0_6] : memref<16x128xf32, #tpu.memory_space<vmem>>, vector<16x128xf32>
    %17 = arith.truncf %16 : vector<16x128xf32> to vector<16x128xbf16>
    %c0_7 = arith.constant 0 : index
    %c0_8 = arith.constant 0 : index
    %c0_9 = arith.constant 0 : index
    %18 = vector.load %arg3[%c0_7, %c0_8, %c0_9] : memref<2x128x512xbf16, #tpu.memory_space<vmem>>, vector<1x128x512xbf16>
    %19 = vector.shape_cast %18 : vector<1x128x512xbf16> to vector<128x512xbf16>
    %cst_10 = arith.constant dense<0.000000e+00> : vector<16x512xf32>
    %20 = tpu.matmul %17, %19, %cst_10 {dimension_numbers = #tpu.dot_dimension_numbers<[1], [0], [0], [1], [0, 0, 1, 1], [], []>} : vector<16x128xbf16>, vector<128x512xbf16>, vector<16x512xf32> -> vector<16x512xf32>
    %21 = vector.extract_strided_slice %20 {offsets = [0, 0], sizes = [16, 128], strides = [1, 1]} : vector<16x512xf32> to vector<16x128xf32>
    %22 = vector.extract_strided_slice %20 {offsets = [0, 128], sizes = [16, 128], strides = [1, 1]} : vector<16x512xf32> to vector<16x128xf32>
    %23 = vector.extract_strided_slice %20 {offsets = [0, 256], sizes = [16, 128], strides = [1, 1]} : vector<16x512xf32> to vector<16x128xf32>
    %24 = vector.extract_strided_slice %20 {offsets = [0, 384], sizes = [16, 1], strides = [1, 1]} : vector<16x512xf32> to vector<16x1xf32>
    %c0_11 = arith.constant 0 : index
    %c0_12 = arith.constant 0 : index
    %c0_13 = arith.constant 0 : index
    %25 = vector.load %arg4[%c0_11, %c0_12, %c0_13] : memref<2x1x128xbf16, #tpu.memory_space<vmem>>, vector<1x1x128xbf16>
    %26 = vector.shape_cast %25 : vector<1x1x128xbf16> to vector<1x128xbf16>
    %cst_14 = arith.constant dense<0.000000e+00> : vector<1x16xf32>
    %27 = tpu.matmul %26, %17, %cst_14 {dimension_numbers = #tpu.dot_dimension_numbers<[1], [1], [0], [0], [0, 0, 1, 0], [], []>} : vector<1x128xbf16>, vector<16x128xbf16>, vector<1x16xf32> -> vector<1x16xf32>
    %28 = vector.broadcast %24 : vector<16x1xf32> to vector<16x16xf32>
    %29 = vector.broadcast %27 : vector<1x16xf32> to vector<16x16xf32>
    %30 = arith.addf %28, %29 : vector<16x16xf32>
    %cst_15 = arith.constant 0.000000e+00 : f32
    %31 = vector.broadcast %cst_15 : f32 to vector<16x16xf32>
    %32 = arith.cmpf ogt, %30, %31 : vector<16x16xf32>
    %cst_16 = arith.constant 2.000000e-01 : f32
    %33 = vector.broadcast %cst_16 : f32 to vector<16x16xf32>
    %34 = arith.mulf %33, %30 : vector<16x16xf32>
    %35 = arith.select %32, %30, %34 : vector<16x16xi1>, vector<16x16xf32>
    %cst_17 = arith.constant dense<0xFF800000> : vector<16xf32>
    %36 = vector.multi_reduction <maximumf>, %35, %cst_17 [1] : vector<16x16xf32> to vector<16xf32>
    %37 = vector.shape_cast %36 : vector<16xf32> to vector<16x1xf32>
    %38 = vector.broadcast %37 : vector<16x1xf32> to vector<16x16xf32>
    %39 = arith.subf %35, %38 : vector<16x16xf32>
    %40 = math.exp %39 : vector<16x16xf32>
    %41 = arith.mulf %40, %8 : vector<16x16xf32>
    %cst_18 = arith.constant dense<0.000000e+00> : vector<16xf32>
    %42 = vector.multi_reduction <add>, %41, %cst_18 [1] : vector<16x16xf32> to vector<16xf32>
    %43 = vector.shape_cast %42 : vector<16xf32> to vector<16x1xf32>
    %44 = tpu.reciprocal %43 {approx = true} : vector<16x1xf32> -> vector<16x1xf32>
    %45 = vector.broadcast %44 : vector<16x1xf32> to vector<16x16xf32>
    %46 = arith.mulf %41, %45 : vector<16x16xf32>
    %47 = arith.truncf %46 : vector<16x16xf32> to vector<16x16xbf16>
    %48 = arith.truncf %21 : vector<16x128xf32> to vector<16x128xbf16>
    %cst_19 = arith.constant dense<0.000000e+00> : vector<16x128xf32>
    %49 = tpu.matmul %47, %48, %cst_19 {dimension_numbers = #tpu.dot_dimension_numbers<[1], [0], [0], [1], [0, 0, 1, 1], [], []>} : vector<16x16xbf16>, vector<16x128xbf16>, vector<16x128xf32> -> vector<16x128xf32>
    %c0_20 = arith.constant 0 : index
    %c0_21 = arith.constant 0 : index
    %c0_22 = arith.constant 0 : index
    %50 = vector.load %arg8[%c0_20, %c0_21, %c0_22] : memref<2x1x128xf32, #tpu.memory_space<vmem>>, vector<1x1x128xf32>
    %51 = vector.shape_cast %50 : vector<1x1x128xf32> to vector<1x128xf32>
    %52 = vector.broadcast %51 : vector<1x128xf32> to vector<16x128xf32>
    %53 = arith.addf %49, %52 : vector<16x128xf32>
    %cst_23 = arith.constant dense<0.000000e+00> : vector<16x128xf32>
    %54 = tpu.matmul %0, %17, %cst_23 {dimension_numbers = #tpu.dot_dimension_numbers<[1], [0], [0], [1], [0, 0, 1, 1], [], []>} : vector<16x16xbf16>, vector<16x128xbf16>, vector<16x128xf32> -> vector<16x128xf32>
    %55 = vector.broadcast %15 : vector<16x1xf32> to vector<16x128xf32>
    %56 = arith.mulf %54, %55 : vector<16x128xf32>
    %57 = arith.truncf %56 : vector<16x128xf32> to vector<16x128xbf16>
    %c0_24 = arith.constant 0 : index
    %c0_25 = arith.constant 0 : index
    %c0_26 = arith.constant 0 : index
    %58 = vector.load %arg5[%c0_24, %c0_25, %c0_26] : memref<2x128x128xbf16, #tpu.memory_space<vmem>>, vector<1x128x128xbf16>
    %59 = vector.shape_cast %58 : vector<1x128x128xbf16> to vector<128x128xbf16>
    %cst_27 = arith.constant dense<0.000000e+00> : vector<16x128xf32>
    %60 = tpu.matmul %57, %59, %cst_27 {dimension_numbers = #tpu.dot_dimension_numbers<[1], [0], [0], [1], [0, 0, 1, 1], [], []>} : vector<16x128xbf16>, vector<128x128xbf16>, vector<16x128xf32> -> vector<16x128xf32>
    %c0_28 = arith.constant 0 : index
    %c0_29 = arith.constant 0 : index
    %c0_30 = arith.constant 0 : index
    %61 = vector.load %arg9[%c0_28, %c0_29, %c0_30] : memref<2x1x128xf32, #tpu.memory_space<vmem>>, vector<1x1x128xf32>
    %62 = vector.shape_cast %61 : vector<1x1x128xf32> to vector<1x128xf32>
    %63 = vector.broadcast %62 : vector<1x128xf32> to vector<16x128xf32>
    %64 = arith.addf %60, %63 : vector<16x128xf32>
    %65 = arith.addf %64, %22 : vector<16x128xf32>
    %66 = arith.truncf %53 : vector<16x128xf32> to vector<16x128xbf16>
    %c0_31 = arith.constant 0 : index
    %c0_32 = arith.constant 0 : index
    %c0_33 = arith.constant 0 : index
    %67 = vector.load %arg6[%c0_31, %c0_32, %c0_33] : memref<2x128x128xbf16, #tpu.memory_space<vmem>>, vector<1x128x128xbf16>
    %68 = vector.shape_cast %67 : vector<1x128x128xbf16> to vector<128x128xbf16>
    %cst_34 = arith.constant dense<0.000000e+00> : vector<16x128xf32>
    %69 = tpu.matmul %66, %68, %cst_34 {dimension_numbers = #tpu.dot_dimension_numbers<[1], [0], [0], [1], [0, 0, 1, 1], [], []>} : vector<16x128xbf16>, vector<128x128xbf16>, vector<16x128xf32> -> vector<16x128xf32>
    %70 = arith.addf %23, %69 : vector<16x128xf32>
    %71 = arith.truncf %65 : vector<16x128xf32> to vector<16x128xbf16>
    %c0_35 = arith.constant 0 : index
    %c0_36 = arith.constant 0 : index
    %c0_37 = arith.constant 0 : index
    %72 = vector.load %arg7[%c0_35, %c0_36, %c0_37] : memref<2x128x128xbf16, #tpu.memory_space<vmem>>, vector<1x128x128xbf16>
    %73 = vector.shape_cast %72 : vector<1x128x128xbf16> to vector<128x128xbf16>
    %cst_38 = arith.constant dense<0.000000e+00> : vector<16x128xf32>
    %74 = tpu.matmul %71, %73, %cst_38 {dimension_numbers = #tpu.dot_dimension_numbers<[1], [0], [0], [1], [0, 0, 1, 1], [], []>} : vector<16x128xbf16>, vector<128x128xbf16>, vector<16x128xf32> -> vector<16x128xf32>
    %75 = arith.addf %70, %74 : vector<16x128xf32>
    %c0_39 = arith.constant 0 : index
    %c0_40 = arith.constant 0 : index
    %c0_41 = arith.constant 0 : index
    %76 = vector.load %arg10[%c0_39, %c0_40, %c0_41] : memref<2x1x128xf32, #tpu.memory_space<vmem>>, vector<1x1x128xf32>
    %77 = vector.shape_cast %76 : vector<1x1x128xf32> to vector<1x128xf32>
    %78 = vector.broadcast %77 : vector<1x128xf32> to vector<16x128xf32>
    %79 = arith.addf %75, %78 : vector<16x128xf32>
    %80 = math.tanh %79 : vector<16x128xf32>
    %81 = arith.truncf %80 : vector<16x128xf32> to vector<16x128xbf16>
    %c1 = arith.constant 1 : index
    %c0_42 = arith.constant 0 : index
    %c0_43 = arith.constant 0 : index
    %82 = vector.load %arg3[%c1, %c0_42, %c0_43] : memref<2x128x512xbf16, #tpu.memory_space<vmem>>, vector<1x128x512xbf16>
    %83 = vector.shape_cast %82 : vector<1x128x512xbf16> to vector<128x512xbf16>
    %cst_44 = arith.constant dense<0.000000e+00> : vector<16x512xf32>
    %84 = tpu.matmul %81, %83, %cst_44 {dimension_numbers = #tpu.dot_dimension_numbers<[1], [0], [0], [1], [0, 0, 1, 1], [], []>} : vector<16x128xbf16>, vector<128x512xbf16>, vector<16x512xf32> -> vector<16x512xf32>
    %85 = vector.extract_strided_slice %84 {offsets = [0, 0], sizes = [16, 128], strides = [1, 1]} : vector<16x512xf32> to vector<16x128xf32>
    %86 = vector.extract_strided_slice %84 {offsets = [0, 128], sizes = [16, 128], strides = [1, 1]} : vector<16x512xf32> to vector<16x128xf32>
    %87 = vector.extract_strided_slice %84 {offsets = [0, 256], sizes = [16, 128], strides = [1, 1]} : vector<16x512xf32> to vector<16x128xf32>
    %88 = vector.extract_strided_slice %84 {offsets = [0, 384], sizes = [16, 1], strides = [1, 1]} : vector<16x512xf32> to vector<16x1xf32>
    %c1_45 = arith.constant 1 : index
    %c0_46 = arith.constant 0 : index
    %c0_47 = arith.constant 0 : index
    %89 = vector.load %arg4[%c1_45, %c0_46, %c0_47] : memref<2x1x128xbf16, #tpu.memory_space<vmem>>, vector<1x1x128xbf16>
    %90 = vector.shape_cast %89 : vector<1x1x128xbf16> to vector<1x128xbf16>
    %cst_48 = arith.constant dense<0.000000e+00> : vector<1x16xf32>
    %91 = tpu.matmul %90, %81, %cst_48 {dimension_numbers = #tpu.dot_dimension_numbers<[1], [1], [0], [0], [0, 0, 1, 0], [], []>} : vector<1x128xbf16>, vector<16x128xbf16>, vector<1x16xf32> -> vector<1x16xf32>
    %92 = vector.broadcast %88 : vector<16x1xf32> to vector<16x16xf32>
    %93 = vector.broadcast %91 : vector<1x16xf32> to vector<16x16xf32>
    %94 = arith.addf %92, %93 : vector<16x16xf32>
    %cst_49 = arith.constant 0.000000e+00 : f32
    %95 = vector.broadcast %cst_49 : f32 to vector<16x16xf32>
    %96 = arith.cmpf ogt, %94, %95 : vector<16x16xf32>
    %cst_50 = arith.constant 2.000000e-01 : f32
    %97 = vector.broadcast %cst_50 : f32 to vector<16x16xf32>
    %98 = arith.mulf %97, %94 : vector<16x16xf32>
    %99 = arith.select %96, %94, %98 : vector<16x16xi1>, vector<16x16xf32>
    %cst_51 = arith.constant dense<0xFF800000> : vector<16xf32>
    %100 = vector.multi_reduction <maximumf>, %99, %cst_51 [1] : vector<16x16xf32> to vector<16xf32>
    %101 = vector.shape_cast %100 : vector<16xf32> to vector<16x1xf32>
    %102 = vector.broadcast %101 : vector<16x1xf32> to vector<16x16xf32>
    %103 = arith.subf %99, %102 : vector<16x16xf32>
    %104 = math.exp %103 : vector<16x16xf32>
    %105 = arith.mulf %104, %8 : vector<16x16xf32>
    %cst_52 = arith.constant dense<0.000000e+00> : vector<16xf32>
    %106 = vector.multi_reduction <add>, %105, %cst_52 [1] : vector<16x16xf32> to vector<16xf32>
    %107 = vector.shape_cast %106 : vector<16xf32> to vector<16x1xf32>
    %108 = tpu.reciprocal %107 {approx = true} : vector<16x1xf32> -> vector<16x1xf32>
    %109 = vector.broadcast %108 : vector<16x1xf32> to vector<16x16xf32>
    %110 = arith.mulf %105, %109 : vector<16x16xf32>
    %111 = arith.truncf %110 : vector<16x16xf32> to vector<16x16xbf16>
    %112 = arith.truncf %85 : vector<16x128xf32> to vector<16x128xbf16>
    %cst_53 = arith.constant dense<0.000000e+00> : vector<16x128xf32>
    %113 = tpu.matmul %111, %112, %cst_53 {dimension_numbers = #tpu.dot_dimension_numbers<[1], [0], [0], [1], [0, 0, 1, 1], [], []>} : vector<16x16xbf16>, vector<16x128xbf16>, vector<16x128xf32> -> vector<16x128xf32>
    %c1_54 = arith.constant 1 : index
    %c0_55 = arith.constant 0 : index
    %c0_56 = arith.constant 0 : index
    %114 = vector.load %arg8[%c1_54, %c0_55, %c0_56] : memref<2x1x128xf32, #tpu.memory_space<vmem>>, vector<1x1x128xf32>
    %115 = vector.shape_cast %114 : vector<1x1x128xf32> to vector<1x128xf32>
    %116 = vector.broadcast %115 : vector<1x128xf32> to vector<16x128xf32>
    %117 = arith.addf %113, %116 : vector<16x128xf32>
    %cst_57 = arith.constant dense<0.000000e+00> : vector<16x128xf32>
    %118 = tpu.matmul %0, %81, %cst_57 {dimension_numbers = #tpu.dot_dimension_numbers<[1], [0], [0], [1], [0, 0, 1, 1], [], []>} : vector<16x16xbf16>, vector<16x128xbf16>, vector<16x128xf32> -> vector<16x128xf32>
    %119 = vector.broadcast %15 : vector<16x1xf32> to vector<16x128xf32>
    %120 = arith.mulf %118, %119 : vector<16x128xf32>
    %121 = arith.truncf %120 : vector<16x128xf32> to vector<16x128xbf16>
    %c1_58 = arith.constant 1 : index
    %c0_59 = arith.constant 0 : index
    %c0_60 = arith.constant 0 : index
    %122 = vector.load %arg5[%c1_58, %c0_59, %c0_60] : memref<2x128x128xbf16, #tpu.memory_space<vmem>>, vector<1x128x128xbf16>
    %123 = vector.shape_cast %122 : vector<1x128x128xbf16> to vector<128x128xbf16>
    %cst_61 = arith.constant dense<0.000000e+00> : vector<16x128xf32>
    %124 = tpu.matmul %121, %123, %cst_61 {dimension_numbers = #tpu.dot_dimension_numbers<[1], [0], [0], [1], [0, 0, 1, 1], [], []>} : vector<16x128xbf16>, vector<128x128xbf16>, vector<16x128xf32> -> vector<16x128xf32>
    %c1_62 = arith.constant 1 : index
    %c0_63 = arith.constant 0 : index
    %c0_64 = arith.constant 0 : index
    %125 = vector.load %arg9[%c1_62, %c0_63, %c0_64] : memref<2x1x128xf32, #tpu.memory_space<vmem>>, vector<1x1x128xf32>
    %126 = vector.shape_cast %125 : vector<1x1x128xf32> to vector<1x128xf32>
    %127 = vector.broadcast %126 : vector<1x128xf32> to vector<16x128xf32>
    %128 = arith.addf %124, %127 : vector<16x128xf32>
    %129 = arith.addf %128, %86 : vector<16x128xf32>
    %130 = arith.truncf %117 : vector<16x128xf32> to vector<16x128xbf16>
    %c1_65 = arith.constant 1 : index
    %c0_66 = arith.constant 0 : index
    %c0_67 = arith.constant 0 : index
    %131 = vector.load %arg6[%c1_65, %c0_66, %c0_67] : memref<2x128x128xbf16, #tpu.memory_space<vmem>>, vector<1x128x128xbf16>
    %132 = vector.shape_cast %131 : vector<1x128x128xbf16> to vector<128x128xbf16>
    %cst_68 = arith.constant dense<0.000000e+00> : vector<16x128xf32>
    %133 = tpu.matmul %130, %132, %cst_68 {dimension_numbers = #tpu.dot_dimension_numbers<[1], [0], [0], [1], [0, 0, 1, 1], [], []>} : vector<16x128xbf16>, vector<128x128xbf16>, vector<16x128xf32> -> vector<16x128xf32>
    %134 = arith.addf %87, %133 : vector<16x128xf32>
    %135 = arith.truncf %129 : vector<16x128xf32> to vector<16x128xbf16>
    %c1_69 = arith.constant 1 : index
    %c0_70 = arith.constant 0 : index
    %c0_71 = arith.constant 0 : index
    %136 = vector.load %arg7[%c1_69, %c0_70, %c0_71] : memref<2x128x128xbf16, #tpu.memory_space<vmem>>, vector<1x128x128xbf16>
    %137 = vector.shape_cast %136 : vector<1x128x128xbf16> to vector<128x128xbf16>
    %cst_72 = arith.constant dense<0.000000e+00> : vector<16x128xf32>
    %138 = tpu.matmul %135, %137, %cst_72 {dimension_numbers = #tpu.dot_dimension_numbers<[1], [0], [0], [1], [0, 0, 1, 1], [], []>} : vector<16x128xbf16>, vector<128x128xbf16>, vector<16x128xf32> -> vector<16x128xf32>
    %139 = arith.addf %134, %138 : vector<16x128xf32>
    %c1_73 = arith.constant 1 : index
    %c0_74 = arith.constant 0 : index
    %c0_75 = arith.constant 0 : index
    %140 = vector.load %arg10[%c1_73, %c0_74, %c0_75] : memref<2x1x128xf32, #tpu.memory_space<vmem>>, vector<1x1x128xf32>
    %141 = vector.shape_cast %140 : vector<1x1x128xf32> to vector<1x128xf32>
    %142 = vector.broadcast %141 : vector<1x128xf32> to vector<16x128xf32>
    %143 = arith.addf %139, %142 : vector<16x128xf32>
    %144 = math.tanh %143 : vector<16x128xf32>
    %145 = arith.truncf %144 : vector<16x128xf32> to vector<16x128xbf16>
    %146 = tpu.iota {dimensions = array<i32: 0>} : vector<16x128xi32>
    %c0_76 = arith.constant 0 : index
    %c0_77 = arith.constant 0 : index
    %147 = vector.load %arg2[%c0_76, %c0_77] : memref<2x128xi32, #tpu.memory_space<vmem>>, vector<2x128xi32>
    %148 = vector.extract_strided_slice %147 {offsets = [0, 0], sizes = [1, 128], strides = [1, 1]} : vector<2x128xi32> to vector<1x128xi32>
    %149 = vector.broadcast %148 : vector<1x128xi32> to vector<16x128xi32>
    %150 = arith.cmpi eq, %146, %149 : vector<16x128xi32>
    %cst_78 = arith.constant 1.000000e+00 : f32
    %cst_79 = arith.constant 0.000000e+00 : f32
    %151 = vector.broadcast %cst_78 : f32 to vector<16x128xf32>
    %152 = vector.broadcast %cst_79 : f32 to vector<16x128xf32>
    %153 = arith.select %150, %151, %152 : vector<16x128xi1>, vector<16x128xf32>
    %154 = arith.truncf %153 : vector<16x128xf32> to vector<16x128xbf16>
    %155 = vector.extract_strided_slice %147 {offsets = [1, 0], sizes = [1, 128], strides = [1, 1]} : vector<2x128xi32> to vector<1x128xi32>
    %156 = vector.broadcast %155 : vector<1x128xi32> to vector<16x128xi32>
    %157 = arith.cmpi eq, %146, %156 : vector<16x128xi32>
    %cst_80 = arith.constant 1.000000e+00 : f32
    %cst_81 = arith.constant 0.000000e+00 : f32
    %158 = vector.broadcast %cst_80 : f32 to vector<16x128xf32>
    %159 = vector.broadcast %cst_81 : f32 to vector<16x128xf32>
    %160 = arith.select %157, %158, %159 : vector<16x128xi1>, vector<16x128xf32>
    %161 = arith.truncf %160 : vector<16x128xf32> to vector<16x128xbf16>
    %cst_82 = arith.constant dense<0.000000e+00> : vector<128x128xf32>
    %162 = tpu.matmul %145, %154, %cst_82 {dimension_numbers = #tpu.dot_dimension_numbers<[0], [0], [1], [1], [0, 1, 1, 1], [], []>} : vector<16x128xbf16>, vector<16x128xbf16>, vector<128x128xf32> -> vector<128x128xf32>
    %cst_83 = arith.constant dense<0.000000e+00> : vector<128x128xf32>
    %163 = tpu.matmul %145, %161, %cst_83 {dimension_numbers = #tpu.dot_dimension_numbers<[0], [0], [1], [1], [0, 1, 1, 1], [], []>} : vector<16x128xbf16>, vector<16x128xbf16>, vector<128x128xf32> -> vector<128x128xf32>
    %164 = arith.mulf %162, %163 : vector<128x128xf32>
    %cst_84 = arith.constant dense<0.000000e+00> : vector<128xf32>
    %165 = vector.multi_reduction <add>, %164, %cst_84 [0] : vector<128x128xf32> to vector<128xf32>
    %166 = vector.shape_cast %165 : vector<128xf32> to vector<1x128xf32>
    %c0_85 = arith.constant 0 : index
    %c0_86 = arith.constant 0 : index
    %167 = vector.load %arg11[%c0_85, %c0_86] : memref<1x128xf32, #tpu.memory_space<vmem>>, vector<1x128xf32>
    tpu.vector_store %arg11[%c0_85, %c0_86], %166 {strides = array<i32>} : memref<1x128xf32, #tpu.memory_space<vmem>>, vector<1x128xf32>,
    return
  }
}

</mosaic_0001>

<bundles_post_ra>
// kernel: tpu_custom_call.1
= control target key start
LH: loop header
LB: loop body
LE: loop exit
PB: predicated region body
PF: predicated region fallthrough
CT: control target
= control target key end

     0   :  { %16 = vsyncpa [#allocation3], 0  ;;  %s2648_s0 = inlined_call_operand.hbm [shape: f32[16,128], index: 0, kind: input, shape index: {}]   ;;  %s2649_s1 = inlined_call_operand.hbm [shape: bf16[16,16], index: 1, kind: input, shape index: {}]   ;;  %s2650_s2 = inlined_call_operand.vmem [shape: s32[2,128], index: 2, kind: input, shape index: {}]   ;;  %s2651_s3 = inlined_call_operand.hbm [shape: bf16[2,128,512], index: 3, kind: input, shape index: {}]   ;;  %s2652_s4 = inlined_call_operand.vmem [shape: bf16[2,1,128], index: 4, kind: input, shape index: {}]   ;;  %s2653_s5 = inlined_call_operand.hbm [shape: bf16[2,128,128], index: 5, kind: input, shape index: {}]   ;;  %s2654_s6 = inlined_call_operand.hbm [shape: bf16[2,128,128], index: 6, kind: input, shape index: {}]   ;;  %s2655_s7 = inlined_call_operand.hbm [shape: bf16[2,128,128], index: 7, kind: input, shape index: {}]   ;;  %s2656_s8 = inlined_call_operand.vmem [shape: f32[2,1,128], index: 8, kind: input, shape index: {}]   ;;  %s2657_s9 = inlined_call_operand.vmem [shape: f32[2,1,128], index: 9, kind: input, shape index: {}]   ;;  %s2658_s10 = inlined_call_operand.vmem [shape: f32[2,1,128], index: 10, kind: input, shape index: {}]   ;;  %s2659_s11 = inlined_call_operand.hbm [shape: f32[1,128], index: 11, kind: output, shape index: {}]  }
   0x1   :  { %17 = vsyncpa [#allocation6], 0 }
   0x2   :  { %18 = vsyncpa [#allocation9], 0 }
   0x3   :  { %19 = vsyncpa [#allocation12], 0  ;;  %s38_s19 = sshll.u32 %s2649_s1, 4  ;;  %s39_s19 = int_to_ptr.hbm [resolvable:$true] %s38_s19 }
   0x4   :  { %20 = vsyncpa [#allocation4], 0  ;;  %s2415_s20 = smov [#allocation5]   ;;  %s68_s24 = sshll.u32 %s2653_s5, 4  ;;  %s69_s24 = int_to_ptr.hbm [resolvable:$true] %s68_s24 }
   0x5   :  { %s40_s21 = sshll.u32 %s2415_s20, 4  ;;  %s2416_s25 = smov 64   ;;  %s41_s21 = int_to_ptr.vmem [resolvable:$true] %s40_s21 }
   0x6   :  { %s2417_s26 = smov 4   ;;  %s2418_s27 = smov [#allocation8]  }
   0x7   :  { %46 = dma.hbm_to_vmem [thread:$0]  %s39_s19, 128, %s41_s21, [#allocation6], %s2416_s25, %s2416_s25, %s2417_s26  }
   0x8   :  { %s70_s28 = sshll.u32 %s2418_s27, 4  ;;  %s25_s30 = sshll.u32 %s2648_s0, 4  ;;  %s71_s28 = int_to_ptr.vmem [resolvable:$true] %s70_s28  ;;  %s26_s30 = int_to_ptr.hbm [resolvable:$true] %s25_s30 }
   0x9   :  { %76 = dma.hbm_to_vmem [thread:$0]  %s69_s24, 2048, %s71_s28, [#allocation9], %s2416_s25, %s2416_s25, %s2417_s26  }
   0xa   :  { %s2419_s5 = smov [#allocation2]   ;;  %s53_s15 = sshll.u32 %s2651_s3, 4  ;;  %s54_s15 = int_to_ptr.hbm [resolvable:$true] %s53_s15 }
   0xb   :  { %s27_s12 = sshll.u32 %s2419_s5, 4  ;;  %s2420_s16 = smov 128   ;;  %s28_s12 = int_to_ptr.vmem [resolvable:$true] %s27_s12 }
   0xc   :  { %s2421_s17 = smov 8   ;;  %s2422_s18 = smov [#allocation7]  }
   0xd   :  { %33 = dma.hbm_to_vmem [thread:$0]  %s26_s30, 256, %s28_s12, [#allocation3], %s2420_s16, %s2420_s16, %s2421_s17  }
   0xe   :  { %s55_s19 = sshll.u32 %s2422_s18, 4  ;;  %s2423_s0 = smov 256   ;;  %s56_s19 = int_to_ptr.vmem [resolvable:$true] %s55_s19 }
   0xf   :  { %s2424_s20 = smov 16   ;;  %s81_s23 = sshll.u32 %s2654_s6, 4  ;;  %s82_s23 = int_to_ptr.hbm [resolvable:$true] %s81_s23 }
  0x10   :  { %61 = dma.hbm_to_vmem [thread:$0]  %s54_s15, 8192, %s56_s19, [#allocation6], %s2423_s0, %s2423_s0, %s2424_s20  }
  0x11   :  { %s2425_s24 = smov [#allocation10]   ;;  %s94_s29 = sshll.u32 %s2655_s7, 4  ;;  %s95_s29 = int_to_ptr.hbm [resolvable:$true] %s94_s29 }
  0x12   :  { %s83_s27 = sshll.u32 %s2425_s24, 4  ;;  %s2426_s1 = smov [#allocation11]   ;;  %s84_s27 = int_to_ptr.vmem [resolvable:$true] %s83_s27 }
  0x13   :  { %89 = dma.hbm_to_vmem [thread:$0]  %s82_s23, 2048, %s84_s27, [#allocation9], %s2416_s25, %s2416_s25, %s2417_s26  }
  0x14   :  { %s96_s30 = sshll.u32 %s2426_s1, 4  ;;  %s97_s30 = int_to_ptr.vmem [resolvable:$true] %s96_s30 }
  0x15   :  { %102 = dma.hbm_to_vmem [thread:$0]  %s95_s29, 2048, %s97_s30, [#allocation12], %s2416_s25, %s2416_s25, %s2417_s26  }
  0x16   :  { %2405 = dma.done.wait [#allocation3], 256  }
  0x17   :  { %2406 = vsyncadd [#allocation3], 4294967040 }
  0x18   :  { %2407 = dma.done.wait [#allocation6], 8320  }
  0x19   :  { %2408 = vsyncadd [#allocation6], 4294958976 }
  0x1a   :  { %2409 = dma.done.wait [#allocation9], 4096  }
  0x1b   :  { %2410 = vsyncadd [#allocation9], 4294963200 }
  0x1c   :  { %2411 = dma.done.wait [#allocation12], 2048  }
  0x1d   :  { %2412 = vsyncadd [#allocation12], 4294965248  ;;  %v1712_v0 = vld [vmem:[#allocation7 + $0xe8] sm:$0xf]  ;;  %v2102_v1 = vld [vmem:[#allocation7 + $0xf4] sm:$0xf0] }
  0x1e   :  { %v1696_v2 = vld [vmem:[#allocation7 + $0xc8] sm:$0xf]  ;;  %v1713_v3 = vor.u32 %v2102_v1, %v1712_v0  ;;  %v2098_v4 = vld [vmem:[#allocation7 + $0xd4] sm:$0xf0]  ;;  %v2100_v23 = vld [vmem:[#allocation7 + $0xec] sm:$0xf] }
  0x1f   :  { %v1697_v5 = vor.u32 %v2098_v4, %v1696_v2  ;;  %v1680_v6 = vld [vmem:[#allocation7 + $0xa8] sm:$0xf]  ;;  %v2094_v7 = vld [vmem:[#allocation7 + $0xb4] sm:$0xf0]  ;;  %v1714_v24 = vld [vmem:[#allocation7 + $0xf8] sm:$0xf0] }
  0x20   :  { %385 = vmatpush.bf16.msra.mxu2 %v1713_v3  ;;  %v1681_v8 = vor.u32 %v2094_v7, %v1680_v6  ;;  %v1664_v9 = vld [vmem:[#allocation7 + $0x88] sm:$0xf]  ;;  %v2090_v10 = vld [vmem:[#allocation7 + $0x94] sm:$0xf0]  ;;  %v163_v27 = vld [vmem:[#allocation2 + $0x8] sm:$0xff]  ;;  %v1717_v28 = vor.u32 %v2100_v23, %v1714_v24  ;;  %v2427_v52 = vmov 0  }
  0x21   :  { %v1665_v11 = vor.u32 %v2090_v10, %v1664_v9  ;;  %v1648_v12 = vld [vmem:[#allocation7 + $0x68] sm:$0xf]  ;;  %v2086_v13 = vld [vmem:[#allocation7 + $0x74] sm:$0xf0]  ;;  %v2096_v29 = vld [vmem:[#allocation7 + $0xcc] sm:$0xf]  ;;  %2200 = vset.pattern.permute.xlu0 %v2427_v52  ;;  %2201 = vset.pattern.permute.xlu2 %v2427_v52 }
  0x22   :  { %v1649_v14 = vor.u32 %v2086_v13, %v1648_v12  ;;  %v1632_v15 = vld [vmem:[#allocation7 + $0x48] sm:$0xf]  ;;  %v2082_v16 = vld [vmem:[#allocation7 + $0x54] sm:$0xf0]  ;;  %v1698_v30 = vld [vmem:[#allocation7 + $0xd8] sm:$0xf0]  ;;  %2202 = vset.pattern.permute.xlu1 %v2427_v52 }
  0x23   :  { %v1633_v17 = vor.u32 %v2082_v16, %v1632_v15  ;;  %v1616_v18 = vld [vmem:[#allocation7 + $0x28] sm:$0xf]  ;;  %v2078_v19 = vld [vmem:[#allocation7 + $0x34] sm:$0xf0]  ;;  %v1701_v32 = vor.u32 %v2096_v29, %v1698_v30  ;;  %v2092_v33 = vld [vmem:[#allocation7 + $0xac] sm:$0xf] }
  0x24   :  { %386 = vmatpush.bf16.msra.mxu2 %v1697_v5  ;;  %v1617_v20 = vor.u32 %v2078_v19, %v1616_v18  ;;  %v1600_v21 = vld [vmem:[#allocation7 + $0x8] sm:$0xf]  ;;  %v2074_v22 = vld [vmem:[#allocation7 + $0x14] sm:$0xf0]  ;;  %v1682_v34 = vld [vmem:[#allocation7 + $0xb8] sm:$0xf0] }
  0x25   :  { %v1601_v25 = vor.u32 %v2074_v22, %v1600_v21  ;;  %v162_v26 = vld [vmem:[#allocation2] sm:$0xff]  ;;  %v1685_v35 = vor.u32 %v2092_v33, %v1682_v34  ;;  %v1666_v37 = vld [vmem:[#allocation7 + $0x98] sm:$0xf0]  ;;  %v1704_v59 = vld [vmem:[#allocation7 + $0xe0] sm:$0xf]  ;;  %vm149_vm0 = vcmask 130048  }
  0x26   :  { %v2521_v31 = vpack.c.bf16 %v163_v27, %v162_v26  ;;  %v2088_v36 = vld [vmem:[#allocation7 + $0x8c] sm:$0xf]  ;;  %v1650_v40 = vld [vmem:[#allocation7 + $0x78] sm:$0xf0]  ;;  %v413_v51 = vld [vmem:[%s2652_s4] sm:$0x1] }
  0x27   :  { %v1669_v38 = vor.u32 %v2088_v36, %v1666_v37  ;;  %v2084_v39 = vld [vmem:[#allocation7 + $0x6c] sm:$0xf]  ;;  %v1634_v43 = vld [vmem:[#allocation7 + $0x58] sm:$0xf0]  ;;  %v2101_v60 = vld [vmem:[#allocation7 + $0xec] sm:$0xf0] }
  0x28   :  { %387 = vmatpush.bf16.msra.mxu2 %v1681_v8  ;;  %v1653_v41 = vor.u32 %v2084_v39, %v1650_v40  ;;  %v2080_v42 = vld [vmem:[#allocation7 + $0x4c] sm:$0xf]  ;;  %v1618_v46 = vld [vmem:[#allocation7 + $0x38] sm:$0xf0]  ;;  %v1688_v61 = vld [vmem:[#allocation7 + $0xc0] sm:$0xf]  ;;  %v1705_v62 = vor.u32 %v2101_v60, %v1704_v59 }
  0x29   :  { %v1637_v44 = vor.u32 %v2080_v42, %v1634_v43  ;;  %v2076_v45 = vld [vmem:[#allocation7 + $0x2c] sm:$0xf]  ;;  %v1602_v49 = vld [vmem:[#allocation7 + $0x18] sm:$0xf0]  ;;  %v2097_v63 = vld [vmem:[#allocation7 + $0xcc] sm:$0xf0] }
  0x2a   :  { %v1621_v47 = vor.u32 %v2076_v45, %v1618_v46  ;;  %v2072_v48 = vld [vmem:[#allocation7 + $0xc] sm:$0xf]  ;;  %v2534_v0 = vld [vmem:[#allocation5] sm:$0xff]  ;;  %357 = vmatpush.bf16.msra.mxu0 %v1705_v62  ;;  %v1689_v1 = vor.u32 %v2097_v63, %v1688_v61  ;;  %v1672_v3 = vld [vmem:[#allocation7 + $0xa0] sm:$0xf]  ;;  %v138_v45 = vlaneseq  ;;  %s1577_s23 = sshll.u32 %s2659_s11, 4  ;;  %s1578_s23 = int_to_ptr.hbm [resolvable:$true] %s1577_s23 }
  0x2b   :  { %v1605_v50 = vor.u32 %v2072_v48, %v1602_v49  ;;  %v2538_v2 = vld [vmem:[#allocation5] sm:$0xff]   ;;  %v2093_v4 = vld [vmem:[#allocation7 + $0xac] sm:$0xf0]  ;;  %v1656_v8 = vld [vmem:[#allocation7 + $0x80] sm:$0xf] }
  0x2c   :  { %388 = vmatpush.bf16.msra.mxu2 %v1665_v11  ;;  %v136_v5 = vunpack.c.l.bf16 %v2538_v2  ;;  %v1673_v7 = vor.u32 %v2093_v4, %v1672_v3  ;;  %v2089_v9 = vld [vmem:[#allocation7 + $0x8c] sm:$0xf0]  ;;  %v137_v10 = vunpack.c.h.bf16 %v2538_v2  ;;  %v1640_v12 = vld [vmem:[#allocation7 + $0x60] sm:$0xf]  ;;  %v2110_v37 = vld [vmem:[#allocation8 + $0x38] sm:$0xff]  ;;  %v2428_v4 = vmov 0.0  }
  0x2d   :  { %v1657_v11 = vor.u32 %v2089_v9, %v1656_v8  ;;  %v2085_v13 = vld [vmem:[#allocation7 + $0x6c] sm:$0xf0]  ;;  %v1608_v22 = vld [vmem:[#allocation7 + $0x20] sm:$0xf]  ;;  %v1706_v40 = vld [vmem:[#allocation7 + $0xf0] sm:$0xf0]  ;;  %586 = vmatpush.bf16.msra.mxu3 %v2110_v37 }
  0x2e   :  { %v150_v6 = vsel %vm149_vm0, %v136_v5, 0.0  ;;  %358 = vmatpush.bf16.msra.mxu0 %v1689_v1  ;;  %v1641_v16 = vor.u32 %v2085_v13, %v1640_v12  ;;  %v2081_v18 = vld [vmem:[#allocation7 + $0x4c] sm:$0xf0]  ;;  %v1674_v48 = vld [vmem:[#allocation7 + $0xb0] sm:$0xf0]  ;;  %v2108_v49 = vld [vmem:[#allocation8 + $0x28] sm:$0xff] }
  0x2f   :  { %151 = vadd.xlane.f32.xlu2 %v150_v6  ;;  %v2077_v24 = vld [vmem:[#allocation7 + $0x2c] sm:$0xf0]  ;;  %v2107_v59 = vld [vmem:[#allocation8 + $0x20] sm:$0xff]  ;;  %v1642_v3 = vld [vmem:[#allocation7 + $0x70] sm:$0xf0] }
  0x30   :  { %389 = vmatpush.bf16.msra.mxu2 %v1649_v14  ;;  %v153_v14 = vsel %vm149_vm0, %v137_v10, 0.0  ;;  %v1609_v27 = vor.u32 %v2077_v24, %v1608_v22  ;;  %v2073_v29 = vld [vmem:[#allocation7 + $0xc] sm:$0xf0]  ;;  %v2083_v1 = vld [vmem:[#allocation7 + $0x64] sm:$0xf] }
  0x31   :  { %v2109_v42 = vld [vmem:[#allocation8 + $0x30] sm:$0xff]  ;;  %v1645_v9 = vor.u32 %v2083_v1, %v1642_v3  ;;  %v2079_v13 = vld [vmem:[#allocation7 + $0x44] sm:$0xf]  ;;  %v2114_v3 = vld [vmem:[#allocation10 + $0x18] sm:$0xff] }
  0x32   :  { %359 = vmatpush.bf16.msra.mxu0 %v1673_v7  ;;  %587 = vmatpush.bf16.msra.mxu3 %v2109_v42  ;;  %v2106_v7 = vld [vmem:[#allocation8 + $0x18] sm:$0xff]  ;;  %v2075_v22 = vld [vmem:[#allocation7 + $0x24] sm:$0xf] }
  0x33   :  { %v2103_v37 = vld [vmem:[#allocation8] sm:$0xff] }
  0x34   :  { %390 = vmatpush.bf16.msra.mxu2 %v1633_v17  ;;  %v1624_v17 = vld [vmem:[#allocation7 + $0x40] sm:$0xf] }
  0x35   :  { %v1625_v21 = vor.u32 %v2081_v18, %v1624_v17  ;;  %v2105_v17 = vld [vmem:[#allocation8 + $0x10] sm:$0xff]  ;;  %v2115_v1 = vld [vmem:[#allocation10 + $0x20] sm:$0xff] }
  0x36   :  { %360 = vmatpush.bf16.msra.mxu0 %v1657_v11  ;;  %588 = vmatpush.bf16.msra.mxu3 %v2108_v49 }
  0x37   :  { %154 = vadd.xlane.f32.xlu2 %v153_v14  ;;  %v1626_v14 = vld [vmem:[#allocation7 + $0x50] sm:$0xf0] }
  0x38   :  { %391 = vmatpush.bf16.msra.mxu2 %v1617_v20 }
  0x3a   :  { %361 = vmatpush.bf16.msra.mxu0 %v1641_v16  ;;  %589 = vmatpush.bf16.msra.mxu3 %v2107_v59  ;;  %v2116_v59 = vld [vmem:[#allocation10 + $0x28] sm:$0xff] }
  0x3c   :  { %392 = vmatpush.bf16.msra.mxu2 %v1601_v25 }
  0x3e   :  { %362 = vmatpush.bf16.msra.mxu0 %v1625_v21  ;;  %590 = vmatpush.bf16.msra.mxu3 %v2106_v7  ;;  %v1629_v21 = vor.u32 %v2079_v13, %v1626_v14  ;;  %v2203_v7 = vld [vmem:[%s2657_s9] ss:$0 sm:$0xff] }
  0x3f   :  { %393 = vmatmul.bf16.vlgmr.msra.gmra.mxu2 %v2521_v31 }
  0x40   :  { %399 = vmatpush.bf16.msrb.mxu2 %v1717_v28  ;;  %v1592_v28 = vld [vmem:[#allocation7] sm:$0xf] }
  0x41   :  { %v1593_v33 = vor.u32 %v2073_v29, %v1592_v28 }
  0x42   :  { %363 = vmatpush.bf16.msra.mxu0 %v1609_v27  ;;  %591 = vmatpush.bf16.msra.mxu3 %v2105_v17 }
  0x44   :  { %400 = vmatpush.bf16.msrb.mxu2 %v1701_v32 }
  0x46   :  { %364 = vmatpush.bf16.msra.mxu0 %v1593_v33 }
  0x48   :  { %401 = vmatpush.bf16.msrb.mxu2 %v1685_v35 }
  0x49   :  { %365 = vmatmul.bf16.vlgmr.msra.gmra.mxu0 %v2521_v31 }
  0x4c   :  { %402 = vmatpush.bf16.msrb.mxu2 %v1669_v38  ;;  %v2099_v38 = vld [vmem:[#allocation7 + $0xe4] sm:$0xf] }
  0x4d   :  { %v1709_v43 = vor.u32 %v2099_v38, %v1706_v40 }
  0x4f   :  { %371 = vmatpush.bf16.msra.mxu1 %v1709_v43 }
  0x50   :  { %403 = vmatpush.bf16.msrb.mxu2 %v1653_v41  ;;  %v2095_v41 = vld [vmem:[#allocation7 + $0xc4] sm:$0xf] }
  0x54   :  { %404 = vmatpush.bf16.msrb.mxu2 %v1637_v44  ;;  %v1690_v44 = vld [vmem:[#allocation7 + $0xd0] sm:$0xf0] }
  0x55   :  { %v1693_v46 = vor.u32 %v2095_v41, %v1690_v44  ;;  %v2126_v44 = vld [vmem:[#allocation11 + $0x38] sm:$0xff] }
  0x57   :  { %372 = vmatpush.bf16.msra.mxu1 %v1693_v46  ;;  %v2124_v46 = vld [vmem:[#allocation11 + $0x28] sm:$0xff] }
  0x58   :  { %405 = vmatpush.bf16.msrb.mxu2 %v1621_v47  ;;  %v2091_v47 = vld [vmem:[#allocation7 + $0xa4] sm:$0xf] }
  0x59   :  { %v1677_v52 = vor.u32 %v2091_v47, %v1674_v48  ;;  %v2123_v47 = vld [vmem:[#allocation11 + $0x20] sm:$0xff]  ;;  %v2122_v48 = vld [vmem:[#allocation11 + $0x18] sm:$0xff] }
  0x5b   :  { %373 = vmatpush.bf16.msra.mxu1 %v1677_v52 }
  0x5c   :  { %406 = vmatpush.bf16.msrb.mxu2 %v1605_v50  ;;  %v2553_v50 = vshrl.u32 %v138_v45, 7 }
  0x5e   :  { %v2558_v8 = vadd.s32 8, %v2553_v50 }
  0x5f   :  { %407 = vmatmul.bf16.vlgmr.msrb.gmra.mxu2 %v2521_v31 }
  0x60   :  { %421 = vmatpush.bf16.xpose.msra.mxu2 %v2521_v31 }
  0x68   :  { %508 = vmatpush.bf16.msrb.mxu2 %v2521_v31 }
  0x6f   :  { %422 = vmatmul.bf16.vlgmr.msra.gmra.mxu2 %v413_v51  ;;  %v142_v51 = vand.u32 127, %v138_v45  ;;  %v2125_v45 = vld [vmem:[#allocation11 + $0x30] sm:$0xff] }
  0x71   :  { %vm143_vm3 = vcmp.eq.s32.totalorder %v2553_v50, %v142_v51  ;;  %vm144_vm4 = vcmp.eq.s32.totalorder %v2558_v8, %v142_v51  ;;  %v2121_v51 = vld [vmem:[#allocation11 + $0x10] sm:$0xff] }
  0x72   :  { %v145_v6 = vsel %vm143_vm3, 1.0, %v2428_v4  ;;  %v146_v24 = vsel %vm144_vm4, 1.0, %v2428_v4 }
  0x73   :  { %v2562_v11 = vmax.f32 %v136_v5, %v145_v6 }
  0x7f   :  { %1723 = vmatmul.msk.bf16.vlgmr.msrb.gmra.mxu2 %vm149_vm0, %v2534_v0 }
  0xa2   :  { %v2551_v39 = vpop.xlane.xlu2 %151 }
  0xa3   :  { %2209 = vrcp.f32 %v2551_v39  ;;  %vm156_vm5 = vcmp.gt.f32.partialorder %v2551_v39, 0.0 }
  0xaa   :  { %v155_v60 = vpop.xlane.xlu2 %154 }
  0xab   :  { %2211 = vrcp.f32 %v155_v60  ;;  %vm157_vm6 = vcmp.gt.f32.partialorder %v155_v60, 0.0 }
  0xc2   :  { %v2530_v53 = vpop.f32.mrf.mxu2 }
  0xc6   :  { %v366_v42 = vpop.f32.mrf.mxu0 }
  0xca   :  { %v2532_v54 = vpop.f32.mrf.mxu2 }
  0xe2   :  { %v408_v55 = vpop.f32.mrf.mxu2 }
  0xe3   :  { %429 = vperm.xlu0 %2200, %v408_v55  }
  0xea   :  { %v410_v56 = vpop.f32.mrf.mxu2 }
  0xeb   :  { %434 = vperm.xlu0 %2200, %v410_v56   ;;  %v2087_v56 = vld [vmem:[#allocation7 + $0x84] sm:$0xf] }
  0xf2   :  { %v423_v57 = vpop.f32.mrf.mxu2 }
  0xf3   :  { %v437_v15 = vperm.slane %v423_v57, 0  ;;  %v1658_v57 = vld [vmem:[#allocation7 + $0x90] sm:$0xf0] }
  0xf4   :  { %v1661_v63 = vor.u32 %v2087_v56, %v1658_v57  ;;  %v2117_v56 = vld [vmem:[#allocation10 + $0x30] sm:$0xff] }
  0xf6   :  { %374 = vmatpush.bf16.msra.mxu1 %v1661_v63 }
  0xfa   :  { %v425_v58 = vpop.f32.mrf.mxu2  ;;  %375 = vmatpush.bf16.msra.mxu1 %v1645_v9 }
  0xfe   :  { %376 = vmatpush.bf16.msra.mxu1 %v1629_v21  ;;  %v1934_v21 = vld [vmem:[#allocation7 + $0x1e0] sm:$0xf] }
 0x102   :  { %v510_v62 = vpop.f32.mrf.mxu2 }
 0x10a   :  { %v512_v28 = vpop.f32.mrf.mxu2 }
 0x155   :  { %v430_v19 = vpop.permute.xlu0 %429 }
 0x156   :  { %v438_v20 = vadd.f32 %v437_v15, %v430_v19 }
 0x158   :  { %v442_v23 = vmul.f32 0.2, %v438_v20  ;;  %vm440_vm1 = vcmp.gt.f32.partialorder %v438_v20, 0.0 }
 0x15a   :  { %v444_v25 = vsel %vm440_vm1, %v438_v20, %v442_v23  ;;  %v1610_v23 = vld [vmem:[#allocation7 + $0x30] sm:$0xf0] }
 0x15b   :  { %v446_v26 = vsel %vm149_vm0, %v444_v25, -inf }
 0x15c   :  { %447 = vmax.xlane.f32.xlu1 %v446_v26  ;;  %v2104_v26 = vld [vmem:[#allocation8 + $0x8] sm:$0xff] }
 0x15d   :  { %v435_v30 = vpop.permute.xlu0 %434  ;;  %592 = vmatpush.bf16.msra.mxu3 %v2104_v26  ;;  %v1942_v26 = vld [vmem:[#allocation7 + $0x1e8] sm:$0xf] }
 0x15e   :  { %v439_v32 = vadd.f32 %v437_v15, %v435_v30  ;;  %v2210_v15 = vpop.eup %2209  ;;  %v1613_v30 = vor.u32 %v2075_v22, %v1610_v23  ;;  %v2155_v22 = vld [vmem:[#allocation7 + $0x1e4] sm:$0xf] }
 0x15f   :  { %v2212_v18 = vpop.eup %2211 }
 0x160   :  { %v443_v34 = vmul.f32 0.2, %v439_v32  ;;  %vm441_vm2 = vcmp.gt.f32.partialorder %v439_v32, 0.0  ;;  %v2569_v27 = vsel %vm157_vm6, %v2212_v18, 0.0  ;;  %377 = vmatpush.bf16.msra.mxu1 %v1613_v30  ;;  %v2113_v18 = vld [vmem:[#allocation10 + $0x10] sm:$0xff] }
 0x161   :  { %593 = vmatpush.bf16.msra.mxu3 %v2103_v37  ;;  %v2153_v37 = vld [vmem:[#allocation7 + $0x1cc] sm:$0xf0] }
 0x162   :  { %v445_v35 = vsel %vm441_vm2, %v439_v32, %v443_v34  ;;  %v2574_v32 = vmax.f32 %v137_v10, %v146_v24  ;;  %v516_v34 = vmul.f32 %v512_v28, %v2569_v27  ;;  %v368_v10 = vpop.f32.mrf.mxu0  ;;  %v1936_v24 = vld [vmem:[#allocation7 + $0x1f0] sm:$0xf0]  ;;  %v2158_v28 = vld [vmem:[#allocation7 + $0x1f4] sm:$0xf0] }
 0x163   :  { %v449_v36 = vsel %vm149_vm0, %v445_v35, -inf  ;;  %v471_v43 = vpack.c.bf16 %v368_v10, %v366_v42  ;;  %v1943_v30 = vor.u32 %v2158_v28, %v1942_v26  ;;  %v2154_v10 = vld [vmem:[#allocation7 + $0x1d4] sm:$0xf0] }
 0x164   :  { %450 = vmax.xlane.f32.xlu1 %v449_v36  ;;  %v1594_v36 = vld [vmem:[#allocation7 + $0x10] sm:$0xf0]  ;;  %v2142_v26 = vld [vmem:[#allocation7 + $0x174] sm:$0xf0] }
 0x1cf   :  { %v448_v55 = vpop.xlane.xlu1 %447 }
 0x1d0   :  { %v452_v58 = vsub.f32 %v444_v25, %v448_v55  ;;  %v2567_v25 = vsel %vm156_vm5, %v2210_v15, 0.0  ;;  %v2118_v55 = vld [vmem:[#allocation10 + $0x38] sm:$0xff] }
 0x1d1   :  { %v515_v33 = vmul.f32 %v510_v62, %v2567_v25  ;;  %667 = vmatpush.bf16.msrb.mxu0 %v2118_v55  ;;  %v1902_v55 = vld [vmem:[#allocation7 + $0x1a0] sm:$0xf] }
 0x1d2   :  { %v454_v61 = vmul.f32 1.442695, %v452_v58  ;;  %v2119_v58 = vld [vmem:[#allocation11] sm:$0xff] }
 0x1d3   :  { %v517_v41 = vpack.c.bf16 %v516_v34, %v515_v33  ;;  %v2156_v33 = vld [vmem:[#allocation7 + $0x1ec] sm:$0xf]  ;;  %v1944_v34 = vld [vmem:[#allocation7 + $0x1f8] sm:$0xf0] }
 0x1d4   :  { %2213 = vpow2.f32 %v454_v61 }
 0x1d5   :  { %594 = vmatmul.bf16.vlgmr.msra.gmra.mxu3 %v517_v41  ;;  %668 = vmatpush.bf16.msrb.mxu0 %v2117_v56  ;;  %v2147_v56 = vld [vmem:[#allocation7 + $0x1a4] sm:$0xf] }
 0x1d7   :  { %v451_v12 = vpop.xlane.xlu1 %450 }
 0x1d8   :  { %v453_v16 = vsub.f32 %v445_v35, %v451_v12  ;;  %v2071_v35 = vld [vmem:[#allocation7 + $0x4] sm:$0xf] }
 0x1d9   :  { %v1597_v39 = vor.u32 %v2071_v35, %v1594_v36  ;;  %669 = vmatpush.bf16.msrb.mxu0 %v2116_v59  ;;  %v1918_v35 = vld [vmem:[#allocation7 + $0x1c0] sm:$0xf]  ;;  %v1947_v36 = vor.u32 %v2156_v33, %v1944_v34  ;;  %v1910_v59 = vld [vmem:[#allocation7 + $0x1a8] sm:$0xf]  ;;  %v1880_v33 = vld [vmem:[#allocation7 + $0x178] sm:$0xf0] }
 0x1da   :  { %v2214_v19 = vpop.eup %2213  ;;  %v456_v20 = vmul.f32 1.442695, %v453_v16  ;;  %v1919_v41 = vor.u32 %v2153_v37, %v1918_v35  ;;  %v1854_v35 = vld [vmem:[#allocation7 + $0x140] sm:$0xf]  ;;  %v2135_v37 = vld [vmem:[#allocation7 + $0x144] sm:$0xf] }
 0x1db   :  { %v458_v5 = vmul.f32 %v2214_v19, %v2562_v11  ;;  %378 = vmatpush.bf16.msra.mxu1 %v1597_v39  ;;  %v2112_v19 = vld [vmem:[#allocation10 + $0x8] sm:$0xff]  ;;  %v1920_v39 = vld [vmem:[#allocation7 + $0x1d0] sm:$0xf0] }
 0x1dc   :  { %2215 = vpow2.f32 %v456_v20  ;;  %v2111_v20 = vld [vmem:[#allocation10] sm:$0xff] }
 0x1dd   :  { %v460_v29 = vsel %vm149_vm0, %v458_v5, 0.0  ;;  %670 = vmatpush.bf16.msrb.mxu0 %v2115_v1  ;;  %v1912_v1 = vld [vmem:[#allocation7 + $0x1b8] sm:$0xf0] }
 0x1de   :  { %461 = vadd.xlane.f32.xlu0 %v460_v29  ;;  %379 = vmatmul.bf16.vlgmr.msra.gmra.mxu1 %v2521_v31  ;;  %v2120_v31 = vld [vmem:[#allocation11 + $0x8] sm:$0xff]  ;;  %v1939_v29 = vor.u32 %v2155_v22, %v1936_v24 }
 0x1df   :  { %486 = vmatpush.bf16.msrb.mxu1 %v471_v43  ;;  %v2152_v43 = vld [vmem:[#allocation7 + $0x1cc] sm:$0xf]  ;;  %v1878_v24 = vld [vmem:[#allocation7 + $0x168] sm:$0xf] }
 0x1e0   :  { %980 = vmatpush.bf16.msrb.mxu3 %v1939_v29  ;;  %v1879_v29 = vor.u32 %v2142_v26, %v1878_v24 }
 0x1e1   :  { %671 = vmatpush.bf16.msrb.mxu0 %v2114_v3 }
 0x1e2   :  { %v2216_v38 = vpop.eup %2215 }
 0x1e3   :  { %v459_v40 = vmul.f32 %v2216_v38, %v2574_v32  ;;  %748 = vmatpush.bf16.msra.mxu1 %v2126_v44  ;;  %v2151_v38 = vld [vmem:[#allocation7 + $0x1c4] sm:$0xf] }
 0x1e4   :  { %v1923_v42 = vor.u32 %v2151_v38, %v1920_v39  ;;  %v1856_v39 = vld [vmem:[#allocation7 + $0x150] sm:$0xf0] }
 0x1e5   :  { %v463_v2 = vsel %vm149_vm0, %v459_v40, 0.0  ;;  %672 = vmatpush.bf16.msrb.mxu0 %v2113_v18 }
 0x1e6   :  { %464 = vadd.xlane.f32.xlu1 %v463_v2  ;;  %v1926_v2 = vld [vmem:[#allocation7 + $0x1c8] sm:$0xf]  ;;  %981 = vmatpush.bf16.msrb.mxu3 %v1923_v42  ;;  %v1859_v42 = vor.u32 %v2135_v37, %v1856_v39 }
 0x1e7   :  { %749 = vmatpush.bf16.msra.mxu1 %v2125_v45  ;;  %v1927_v44 = vor.u32 %v2154_v10, %v1926_v2  ;;  %v1928_v45 = vld [vmem:[#allocation7 + $0x1d8] sm:$0xf0]  ;;  %v2136_v10 = vld [vmem:[#allocation7 + $0x14c] sm:$0xf] }
 0x1e9   :  { %673 = vmatpush.bf16.msrb.mxu0 %v2112_v19 }
 0x1eb   :  { %750 = vmatpush.bf16.msra.mxu1 %v2124_v46  ;;  %v1931_v46 = vor.u32 %v2152_v43, %v1928_v45  ;;  %v1864_v43 = vld [vmem:[#allocation7 + $0x158] sm:$0xf0]  ;;  %v1838_v45 = vld [vmem:[#allocation7 + $0x120] sm:$0xf] }
 0x1ed   :  { %674 = vmatpush.bf16.msrb.mxu0 %v2111_v20  ;;  %v1870_v20 = vld [vmem:[#allocation7 + $0x160] sm:$0xf] }
 0x1ef   :  { %751 = vmatpush.bf16.msra.mxu1 %v2123_v47  ;;  %v2204_v47 = vld [vmem:[%s2656_s8] ss:$0 sm:$0xff] }
 0x1f1   :  { %994 = vmatpush.bf16.msra.mxu0 %v1943_v30  ;;  %v2140_v30 = vld [vmem:[#allocation7 + $0x16c] sm:$0xf] }
 0x1f2   :  { %v1883_v34 = vor.u32 %v2140_v30, %v1880_v33  ;;  %v2163_v30 = vld [vmem:[#allocation8 + $0x60] sm:$0xff]  ;;  %v2162_v33 = vld [vmem:[#allocation8 + $0x58] sm:$0xff] }
 0x1f3   :  { %752 = vmatpush.bf16.msra.mxu1 %v2122_v48 }
 0x1f5   :  { %995 = vmatpush.bf16.msra.mxu0 %v1927_v44  ;;  %v1867_v44 = vor.u32 %v2136_v10, %v1864_v43 }
 0x1f7   :  { %753 = vmatpush.bf16.msra.mxu1 %v2121_v51 }
 0x1fb   :  { %754 = vmatpush.bf16.msra.mxu1 %v2120_v31  ;;  %v2149_v31 = vld [vmem:[#allocation7 + $0x1ac] sm:$0xf0] }
 0x1ff   :  { %755 = vmatpush.bf16.msra.mxu1 %v2119_v58  ;;  %v1904_v58 = vld [vmem:[#allocation7 + $0x1b0] sm:$0xf0] }
 0x251   :  { %v462_v49 = vpop.xlane.xlu0 %461 }
 0x252   :  { %2217 = vrcp.f32 %v462_v49 }
 0x258   :  { %v2218_v57 = vpop.eup %2217  ;;  %v595_v6 = vpop.f32.mrf.mxu3 }
 0x259   :  { %v465_v52 = vpop.xlane.xlu1 %464  ;;  %v468_v61 = vmul.f32 %v2218_v57, %v458_v5  ;;  %v596_v9 = vadd.f32 %v2203_v7, %v595_v6  ;;  %v2157_v5 = vld [vmem:[#allocation7 + $0x1ec] sm:$0xf0]  ;;  %v1903_v57 = vor.u32 %v2149_v31, %v1902_v55 }
 0x25a   :  { %2219 = vrcp.f32 %v465_v52  ;;  %v1935_v23 = vor.u32 %v2157_v5, %v1934_v21  ;;  %v2145_v6 = vld [vmem:[#allocation7 + $0x18c] sm:$0xf0]  ;;  %v2139_v5 = vld [vmem:[#allocation7 + $0x164] sm:$0xf] }
 0x25b   :  { %v380_v4 = vpop.f32.mrf.mxu1  ;;  %v2141_v21 = vld [vmem:[#allocation7 + $0x16c] sm:$0xf0] }
 0x25c   :  { %v600_v14 = vadd.f32 %v596_v9, %v380_v4  ;;  %966 = vmatpush.bf16.msra.mxu2 %v1935_v23  ;;  %v1886_v4 = vld [vmem:[#allocation7 + $0x180] sm:$0xf]  ;;  %v1871_v22 = vor.u32 %v2141_v21, %v1870_v20  ;;  %v1872_v23 = vld [vmem:[#allocation7 + $0x170] sm:$0xf0] }
 0x25d   :  { %v1887_v9 = vor.u32 %v2145_v6, %v1886_v4  ;;  %v1875_v28 = vor.u32 %v2139_v5, %v1872_v23 }
 0x260   :  { %v2220_v60 = vpop.eup %2219  ;;  %v597_v12 = vpop.f32.mrf.mxu3  ;;  %967 = vmatpush.bf16.msra.mxu2 %v1919_v41  ;;  %v2138_v41 = vld [vmem:[#allocation7 + $0x154] sm:$0xf0] }
 0x261   :  { %v469_v62 = vmul.f32 %v2220_v60, %v459_v40  ;;  %v598_v15 = vadd.f32 %v2203_v7, %v597_v12  ;;  %v2150_v60 = vld [vmem:[#allocation7 + $0x1b4] sm:$0xf0]  ;;  %v2143_v7 = vld [vmem:[#allocation7 + $0x184] sm:$0xf]  ;;  %v1888_v12 = vld [vmem:[#allocation7 + $0x190] sm:$0xf0] }
 0x263   :  { %v470_v63 = vpack.c.bf16 %v469_v62, %v468_v61  ;;  %v382_v13 = vpop.f32.mrf.mxu1  ;;  %v1907_v61 = vor.u32 %v2147_v56, %v1904_v58  ;;  %v1911_v62 = vor.u32 %v2150_v60, %v1910_v59  ;;  %v2132_v56 = vld [vmem:[#allocation7 + $0x12c] sm:$0xf]  ;;  %v1822_v59 = vld [vmem:[#allocation7 + $0x100] sm:$0xf]  ;;  %v2129_v60 = vld [vmem:[#allocation7 + $0x10c] sm:$0xf0] }
 0x264   :  { %v601_v16 = vadd.f32 %v598_v15, %v382_v13  ;;  %968 = vmatpush.bf16.msra.mxu2 %v1903_v57  ;;  %v1894_v13 = vld [vmem:[#allocation7 + $0x188] sm:$0xf]  ;;  %v2146_v15 = vld [vmem:[#allocation7 + $0x194] sm:$0xf0]  ;;  %v1848_v57 = vld [vmem:[#allocation7 + $0x138] sm:$0xf0] }
 0x265   :  { %1718 = vmatmul.msk.bf16.vlgmr.msrb.gmra.mxu1 %vm149_vm0, %v470_v63  ;;  %v2148_v63 = vld [vmem:[#allocation7 + $0x1ac] sm:$0xf]  ;;  %982 = vmatpush.bf16.msrb.mxu3 %v1907_v61  ;;  %v1895_v18 = vor.u32 %v2146_v15, %v1894_v13  ;;  %v1851_v58 = vor.u32 %v2132_v56, %v1848_v57  ;;  %v2127_v61 = vld [vmem:[#allocation7 + $0x104] sm:$0xf] }
 0x266   :  { %v683_v17 = vpack.c.bf16 %v601_v16, %v600_v14  ;;  %1008 = vmatpush.bf16.msrb.mxu1 %v1947_v36  ;;  %v1915_v3 = vor.u32 %v2148_v63, %v1912_v1  ;;  %996 = vmatpush.bf16.msra.mxu0 %v1911_v62  ;;  %v1891_v14 = vor.u32 %v2143_v7, %v1888_v12  ;;  %v2144_v16 = vld [vmem:[#allocation7 + $0x18c] sm:$0xf]  ;;  %v2137_v36 = vld [vmem:[#allocation7 + $0x14c] sm:$0xf0]  ;;  %v1824_v63 = vld [vmem:[#allocation7 + $0x110] sm:$0xf0] }
 0x267   :  { %v1855_v38 = vor.u32 %v2137_v36, %v1854_v35  ;;  %v1823_v62 = vor.u32 %v2129_v60, %v1822_v59  ;;  %v1830_v1 = vld [vmem:[#allocation7 + $0x108] sm:$0xf]  ;;  %v1827_v4 = vor.u32 %v2127_v61, %v1824_v63  ;;  %v2128_v7 = vld [vmem:[#allocation7 + $0x10c] sm:$0xf]  ;;  %v2159_v36 = vld [vmem:[#allocation8 + $0x40] sm:$0xff] }
 0x268   :  { %969 = vmatpush.bf16.msra.mxu2 %v1887_v9  ;;  %v1832_v9 = vld [vmem:[#allocation7 + $0x118] sm:$0xf0]  ;;  %v2160_v35 = vld [vmem:[#allocation8 + $0x48] sm:$0xff] }
 0x269   :  { %983 = vmatpush.bf16.msrb.mxu3 %v1891_v14  ;;  %v1835_v12 = vor.u32 %v2128_v7, %v1832_v9 }
 0x26a   :  { %1009 = vmatpush.bf16.msrb.mxu1 %v1931_v46  ;;  %997 = vmatpush.bf16.msra.mxu0 %v1895_v18  ;;  %v2133_v46 = vld [vmem:[#allocation7 + $0x12c] sm:$0xf0] }
 0x26c   :  { %970 = vmatpush.bf16.msra.mxu2 %v1871_v22 }
 0x26d   :  { %984 = vmatpush.bf16.msrb.mxu3 %v1875_v28  ;;  %v2165_v28 = vld [vmem:[#allocation8 + $0x70] sm:$0xff] }
 0x26e   :  { %1010 = vmatpush.bf16.msrb.mxu1 %v1915_v3  ;;  %998 = vmatpush.bf16.msra.mxu0 %v1879_v29  ;;  %v2130_v3 = vld [vmem:[#allocation7 + $0x114] sm:$0xf0]  ;;  %v2164_v29 = vld [vmem:[#allocation8 + $0x68] sm:$0xff] }
 0x26f   :  { %v1831_v6 = vor.u32 %v2130_v3, %v1830_v1 }
 0x270   :  { %971 = vmatpush.bf16.msra.mxu2 %v1855_v38 }
 0x271   :  { %985 = vmatpush.bf16.msrb.mxu3 %v1859_v42 }
 0x275   :  { %756 = vmatmul.bf16.vlgmr.msra.gmra.mxu1 %v683_v17  ;;  %v1896_v17 = vld [vmem:[#allocation7 + $0x198] sm:$0xf0] }
 0x276   :  { %v1899_v19 = vor.u32 %v2144_v16, %v1896_v17  ;;  %v2205_v17 = vld [vmem:[%s2658_s10] ss:$0 sm:$0xff] }
 0x278   :  { %1011 = vmatpush.bf16.msrb.mxu1 %v1899_v19 }
 0x27c   :  { %1012 = vmatpush.bf16.msrb.mxu1 %v1883_v34  ;;  %v2161_v34 = vld [vmem:[#allocation8 + $0x50] sm:$0xff] }
 0x280   :  { %1013 = vmatpush.bf16.msrb.mxu1 %v1867_v44 }
 0x284   :  { %1014 = vmatpush.bf16.msrb.mxu1 %v1851_v58 }
 0x288   :  { %1015 = vmatpush.bf16.msrb.mxu1 %v1835_v12 }
 0x2e2   :  { %v488_v40 = vpop.f32.mrf.mxu1 }
 0x2e3   :  { %v489_v49 = vadd.f32 %v2204_v47, %v488_v40  ;;  %v1862_v40 = vld [vmem:[#allocation7 + $0x148] sm:$0xf] }
 0x2e4   :  { %v1863_v2 = vor.u32 %v2138_v41, %v1862_v40 }
 0x2e6   :  { %999 = vmatpush.bf16.msra.mxu0 %v1863_v2 }
 0x2ea   :  { %v490_v48 = vpop.f32.mrf.mxu1 }
 0x2eb   :  { %v491_v51 = vadd.f32 %v2204_v47, %v490_v48  ;;  %v2131_v47 = vld [vmem:[#allocation7 + $0x124] sm:$0xf]  ;;  %v1839_v48 = vor.u32 %v2133_v46, %v1838_v45 }
 0x2ed   :  { %v602_v52 = vpack.c.bf16 %v491_v51, %v489_v49  ;;  %v1840_v49 = vld [vmem:[#allocation7 + $0x130] sm:$0xf0]  ;;  %v1846_v51 = vld [vmem:[#allocation7 + $0x128] sm:$0xf]  ;;  %972 = vmatpush.bf16.msra.mxu2 %v1839_v48 }
 0x2ee   :  { %v1843_v55 = vor.u32 %v2131_v47, %v1840_v49 }
 0x2ef   :  { %675 = vmatmul.bf16.vlgmr.msrb.gmra.mxu0 %v602_v52  ;;  %v2134_v52 = vld [vmem:[#allocation7 + $0x134] sm:$0xf0] }
 0x2f0   :  { %v1847_v31 = vor.u32 %v2134_v52, %v1846_v51  ;;  %986 = vmatpush.bf16.msrb.mxu3 %v1843_v55 }
 0x2f1   :  { %973 = vmatpush.bf16.msra.mxu2 %v1823_v62 }
 0x2f2   :  { %1000 = vmatpush.bf16.msra.mxu0 %v1847_v31  ;;  %v757_v13 = vpop.f32.mrf.mxu1 }
 0x2f4   :  { %987 = vmatpush.bf16.msrb.mxu3 %v1827_v4 }
 0x2f6   :  { %1001 = vmatpush.bf16.msra.mxu0 %v1831_v6 }
 0x2fa   :  { %v759_v20 = vpop.f32.mrf.mxu1 }
 0x36c   :  { %v676_v14 = vpop.f32.mrf.mxu0 }
 0x36d   :  { %v681_v15 = vadd.f32 %v676_v14, %v2530_v53  ;;  %v1948_v53 = vld [vmem:[%s2652_s4 + $0x1] sm:$0x1]  ;;  %v2181_v14 = vld [vmem:[#allocation11 + $0x70] sm:$0xff] }
 0x36f   :  { %v762_v16 = vadd.f32 %v757_v13, %v681_v15  ;;  %v2182_v13 = vld [vmem:[#allocation11 + $0x78] sm:$0xff]  ;;  %v2180_v15 = vld [vmem:[#allocation11 + $0x68] sm:$0xff] }
 0x371   :  { %v768_v21 = vadd.f32 %v2205_v17, %v762_v16  ;;  %v2178_v16 = vld [vmem:[#allocation11 + $0x58] sm:$0xff] }
 0x373   :  { %2221 = vtanh.f32 %v768_v21  ;;  %v2174_v21 = vld [vmem:[#allocation10 + $0x78] sm:$0xff] }
 0x374   :  { %v678_v18 = vpop.f32.mrf.mxu0  ;;  %1273 = vmatpush.bf16.msra.mxu1 %v2174_v21 }
 0x375   :  { %v682_v19 = vadd.f32 %v678_v18, %v2532_v54  ;;  %v2166_v54 = vld [vmem:[#allocation8 + $0x78] sm:$0xff]  ;;  %v2176_v18 = vld [vmem:[#allocation11 + $0x48] sm:$0xff] }
 0x376   :  { %1191 = vmatpush.bf16.msrb.mxu0 %v2166_v54  ;;  %v2171_v54 = vld [vmem:[#allocation10 + $0x60] sm:$0xff] }
 0x377   :  { %v763_v5 = vadd.f32 %v759_v20, %v682_v19  ;;  %v2175_v20 = vld [vmem:[#allocation11 + $0x40] sm:$0xff] }
 0x379   :  { %v769_v22 = vadd.f32 %v2205_v17, %v763_v5  ;;  %v2222_v23 = vpop.eup %2221  ;;  %v2177_v17 = vld [vmem:[#allocation11 + $0x50] sm:$0xff] }
 0x37a   :  { %1192 = vmatpush.bf16.msrb.mxu0 %v2165_v28 }
 0x37b   :  { %2223 = vtanh.f32 %v769_v22  ;;  %v2173_v22 = vld [vmem:[#allocation10 + $0x70] sm:$0xff] }
 0x37c   :  { %1274 = vmatpush.bf16.msra.mxu1 %v2173_v22 }
 0x37e   :  { %1193 = vmatpush.bf16.msrb.mxu0 %v2164_v29 }
 0x381   :  { %v2224_v24 = vpop.eup %2223 }
 0x382   :  { %v772_v26 = vpack.c.bf16 %v2224_v24, %v2222_v23  ;;  %1194 = vmatpush.bf16.msrb.mxu0 %v2163_v30  ;;  %v2172_v24 = vld [vmem:[#allocation10 + $0x68] sm:$0xff] }
 0x383   :  { %1275 = vmatpush.bf16.msra.mxu1 %v2172_v24 }
 0x384   :  { %974 = vmatmul.bf16.vlgmr.msra.gmra.mxu2 %v772_v26  ;;  %988 = vmatmul.bf16.vlgmr.msrb.gmra.mxu3 %v772_v26 }
 0x385   :  { %1002 = vmatmul.bf16.vlgmr.msra.gmra.mxu0 %v772_v26  ;;  %1016 = vmatmul.bf16.vlgmr.msrb.gmra.mxu1 %v772_v26 }
 0x386   :  { %1031 = vmatpush.bf16.xpose.msrb.mxu2 %v772_v26  ;;  %1111 = vmatpush.bf16.msra.mxu3 %v772_v26 }
 0x387   :  { %1195 = vmatpush.bf16.msrb.mxu0 %v2162_v33  ;;  %1276 = vmatpush.bf16.msra.mxu1 %v2171_v54 }
 0x38b   :  { %1196 = vmatpush.bf16.msrb.mxu0 %v2161_v34  ;;  %v2170_v34 = vld [vmem:[#allocation10 + $0x58] sm:$0xff] }
 0x38c   :  { %1277 = vmatpush.bf16.msra.mxu1 %v2170_v34 }
 0x38f   :  { %1197 = vmatpush.bf16.msrb.mxu0 %v2160_v35 }
 0x393   :  { %1198 = vmatpush.bf16.msrb.mxu0 %v2159_v36  ;;  %v2206_v36 = vld [vmem:[%s2657_s9 + $0x1] ss:$0 sm:$0xff] }
 0x394   :  { %1951 = vmatmul.msk.bf16.vlgmr.msra.gmra.mxu3 %vm149_vm0, %v2534_v0  ;;  %1032 = vmatmul.bf16.vlgmr.msrb.gmra.mxu2 %v1948_v53 }
 0x402   :  { %v1017_v37 = vpop.f32.mrf.mxu1  ;;  %v1003_v19 = vpop.f32.mrf.mxu0 }
 0x403   :  { %1039 = vperm.xlu2 %2201, %v1017_v37  }
 0x407   :  { %v975_v0 = vpop.f32.mrf.mxu2  ;;  %v2598_v38 = vpop.f32.mrf.mxu3 }
 0x40a   :  { %v1019_v39 = vpop.f32.mrf.mxu1  ;;  %v1005_v5 = vpop.f32.mrf.mxu0 }
 0x40b   :  { %1044 = vperm.xlu1 %2202, %v1019_v39  }
 0x40f   :  { %v977_v40 = vpop.f32.mrf.mxu2  ;;  %v2600_v41 = vpop.f32.mrf.mxu3 }
 0x410   :  { %v1081_v42 = vpack.c.bf16 %v977_v40, %v975_v0 }
 0x412   :  { %1097 = vmatpush.bf16.msra.mxu2 %v1081_v42 }
 0x416   :  { %1355 = vmatpush.bf16.msrb.mxu2 %v2182_v13 }
 0x417   :  { %v1113_v2 = vpop.f32.mrf.mxu3  ;;  %v1033_v10 = vpop.f32.mrf.mxu2 }
 0x418   :  { %v1118_v45 = vmul.f32 %v1113_v2, %v2567_v25  ;;  %v1047_v48 = vperm.slane %v1033_v10, 0  ;;  %v2169_v2 = vld [vmem:[#allocation10 + $0x50] sm:$0xff]  ;;  %v2168_v10 = vld [vmem:[#allocation10 + $0x48] sm:$0xff] }
 0x419   :  { %1278 = vmatpush.bf16.msra.mxu1 %v2169_v2 }
 0x41a   :  { %1356 = vmatpush.bf16.msrb.mxu2 %v2181_v14 }
 0x41d   :  { %1279 = vmatpush.bf16.msra.mxu1 %v2168_v10 }
 0x41e   :  { %1357 = vmatpush.bf16.msrb.mxu2 %v2180_v15 }
 0x41f   :  { %v1115_v43 = vpop.f32.mrf.mxu3  ;;  %v1035_v44 = vpop.f32.mrf.mxu2 }
 0x420   :  { %v1119_v46 = vmul.f32 %v1115_v43, %v2569_v27  ;;  %v2167_v43 = vld [vmem:[#allocation10 + $0x40] sm:$0xff] }
 0x421   :  { %1280 = vmatpush.bf16.msra.mxu1 %v2167_v43 }
 0x422   :  { %v1120_v47 = vpack.c.bf16 %v1119_v46, %v1118_v45  ;;  %v2207_v45 = vld [vmem:[%s2656_s8 + $0x1] ss:$0 sm:$0xff] }
 0x424   :  { %1199 = vmatmul.bf16.vlgmr.msrb.gmra.mxu0 %v1120_v47 }
 0x45d   :  { %v1040_v49 = vpop.permute.xlu2 %1039 }
 0x45e   :  { %v1048_v51 = vadd.f32 %v1047_v48, %v1040_v49 }
 0x460   :  { %v1052_v52 = vmul.f32 0.2, %v1048_v51  ;;  %vm1050_vm7 = vcmp.gt.f32.partialorder %v1048_v51, 0.0 }
 0x462   :  { %v1054_v55 = vsel %vm1050_vm7, %v1048_v51, %v1052_v52  ;;  %v2429_v52 = vmov 1.0|1.0  }
 0x463   :  { %v1056_v31 = vsel %vm149_vm0, %v1054_v55, -inf }
 0x464   :  { %1057 = vmax.xlane.f32.xlu2 %v1056_v31 }
 0x47d   :  { %v1045_v56 = vpop.permute.xlu1 %1044 }
 0x47e   :  { %v1049_v57 = vadd.f32 %v1047_v48, %v1045_v56 }
 0x480   :  { %v1053_v58 = vmul.f32 0.2, %v1049_v57  ;;  %vm1051_vm8 = vcmp.gt.f32.partialorder %v1049_v57, 0.0 }
 0x482   :  { %v1055_v59 = vsel %vm1051_vm8, %v1049_v57, %v1053_v58  ;;  %v2208_v58 = vld [vmem:[%s2658_s10 + $0x1] ss:$0 sm:$0xff]  ;;  %s2430_s10 = smov [#allocation13]  }
 0x483   :  { %v1059_v25 = vsel %vm149_vm0, %v1055_v59, -inf  ;;  %s1575_s20 = sshll.u32 %s2430_s10, 4  ;;  %s1576_s20 = int_to_ptr.vmem [resolvable:$true] %s1575_s20 }
 0x484   :  { %1060 = vmax.xlane.f32.xlu1 %v1059_v25 }
 0x4a1   :  { %v1200_v53 = vpop.f32.mrf.mxu0 }
 0x4a2   :  { %v1201_v0 = vadd.f32 %v2206_v36, %v1200_v53 }
 0x4a4   :  { %v1205_v40 = vadd.f32 %v1201_v0, %v2598_v38  ;;  %v1381_v38 = vld [vmem:[%s2650_s2] sm:$0x3] }
 0x4a5   :  { %v1388_v51 = vperm.slane %v1381_v38, 1 }
 0x4a7   :  { %vm1389_vm11 = vcmp.eq.s32.totalorder %v2553_v50, %v1388_v51  ;;  %vm1390_vm12 = vcmp.eq.s32.totalorder %v2558_v8, %v1388_v51 }
 0x4a8   :  { %vm2060_vm14 = vmpackc.low %vm1390_vm12, %vm1389_vm11 }
 0x4a9   :  { %v1202_v35 = vpop.f32.mrf.mxu0  ;;  %2061 = vmatpush.bf16.msk.msra.mxu0 %vm2060_vm14, %v2429_v52  ;;  %2183 = vmatpush.bf16.msk.msrb.mxu1 %vm2060_vm14, %v2429_v52 }
 0x4aa   :  { %v1203_v37 = vadd.f32 %v2206_v36, %v1202_v35 }
 0x4ac   :  { %v1206_v39 = vadd.f32 %v1203_v37, %v2600_v41  ;;  %v1382_v41 = vperm.slane %v1381_v38, 0 }
 0x4ae   :  { %v1289_v42 = vpack.c.bf16 %v1206_v39, %v1205_v40  ;;  %vm1383_vm9 = vcmp.eq.s32.totalorder %v2553_v50, %v1382_v41  ;;  %vm1384_vm10 = vcmp.eq.s32.totalorder %v2558_v8, %v1382_v41 }
 0x4af   :  { %vm2050_vm13 = vmpackc.low %vm1384_vm10, %vm1383_vm9 }
 0x4b0   :  { %2051 = vmatpush.bf16.msk.msrb.mxu3 %vm2050_vm13, %v2429_v52 }
 0x4d7   :  { %v1058_v27 = vpop.xlane.xlu2 %1057 }
 0x4d8   :  { %v1062_v60 = vsub.f32 %v1054_v55, %v1058_v27 }
 0x4da   :  { %v1064_v61 = vmul.f32 1.442695, %v1062_v60 }
 0x4dc   :  { %2225 = vpow2.f32 %v1064_v61 }
 0x4e2   :  { %v2226_v62 = vpop.eup %2225 }
 0x4e3   :  { %v1068_v63 = vmul.f32 %v2226_v62, %v2562_v11  ;;  %v2179_v11 = vld [vmem:[#allocation11 + $0x60] sm:$0xff] }
 0x4e4   :  { %1358 = vmatpush.bf16.msrb.mxu2 %v2179_v11 }
 0x4e5   :  { %v1070_v1 = vsel %vm149_vm0, %v1068_v63, 0.0 }
 0x4e6   :  { %1071 = vadd.xlane.f32.xlu0 %v1070_v1 }
 0x4e8   :  { %1359 = vmatpush.bf16.msrb.mxu2 %v2178_v16 }
 0x4ec   :  { %1360 = vmatpush.bf16.msrb.mxu2 %v2177_v17 }
 0x4f0   :  { %1361 = vmatpush.bf16.msrb.mxu2 %v2176_v18 }
 0x4f4   :  { %1362 = vmatpush.bf16.msrb.mxu2 %v2175_v20 }
 0x4f7   :  { %v1061_v3 = vpop.xlane.xlu1 %1060 }
 0x4f8   :  { %v1063_v4 = vsub.f32 %v1055_v59, %v1061_v3 }
 0x4fa   :  { %v1066_v6 = vmul.f32 1.442695, %v1063_v4 }
 0x4fc   :  { %2227 = vpow2.f32 %v1066_v6 }
 0x502   :  { %v2228_v7 = vpop.eup %2227 }
 0x503   :  { %v1069_v9 = vmul.f32 %v2228_v7, %v2574_v32 }
 0x505   :  { %v1073_v12 = vsel %vm149_vm0, %v1069_v9, 0.0 }
 0x506   :  { %1074 = vadd.xlane.f32.xlu0 %v1073_v12 }
 0x559   :  { %v1072_v32 = vpop.xlane.xlu0 %1071 }
 0x55a   :  { %2229 = vrcp.f32 %v1072_v32 }
 0x560   :  { %v2230_v26 = vpop.eup %2229 }
 0x561   :  { %v1078_v29 = vmul.f32 %v2230_v26, %v1068_v63 }
 0x579   :  { %v1075_v23 = vpop.xlane.xlu0 %1074 }
 0x57a   :  { %2231 = vrcp.f32 %v1075_v23 }
 0x580   :  { %v2232_v28 = vpop.eup %2231 }
 0x581   :  { %v1079_v30 = vmul.f32 %v2232_v28, %v1069_v9 }
 0x583   :  { %v1080_v33 = vpack.c.bf16 %v1079_v30, %v1078_v29 }
 0x585   :  { %1950 = vmatmul.msk.bf16.vlgmr.msra.gmra.mxu2 %vm149_vm0, %v1080_v33 }
 0x595   :  { %1363 = vmatmul.bf16.vlgmr.msrb.gmra.mxu2 %v1289_v42 }
 0x608   :  { %v1099_v44 = vpop.f32.mrf.mxu2 }
 0x609   :  { %v1100_v47 = vadd.f32 %v2207_v45, %v1099_v44 }
 0x610   :  { %v1101_v46 = vpop.f32.mrf.mxu2 }
 0x611   :  { %v1102_v48 = vadd.f32 %v2207_v45, %v1101_v46 }
 0x613   :  { %v1207_v49 = vpack.c.bf16 %v1102_v48, %v1100_v47 }
 0x615   :  { %1281 = vmatmul.bf16.vlgmr.msra.gmra.mxu1 %v1207_v49 }
 0x618   :  { %v1364_v55 = vpop.f32.mrf.mxu2 }
 0x620   :  { %v1366_v27 = vpop.f32.mrf.mxu2 }
 0x692   :  { %v1282_v31 = vpop.f32.mrf.mxu1 }
 0x693   :  { %v1287_v56 = vadd.f32 %v1282_v31, %v1003_v19 }
 0x695   :  { %v1369_v57 = vadd.f32 %v1364_v55, %v1287_v56 }
 0x697   :  { %v1376_v50 = vadd.f32 %v2208_v58, %v1369_v57 }
 0x699   :  { %2233 = vtanh.f32 %v1376_v50 }
 0x69a   :  { %v1284_v59 = vpop.f32.mrf.mxu1 }
 0x69b   :  { %v1288_v25 = vadd.f32 %v1284_v59, %v1005_v5 }
 0x69d   :  { %v1370_v60 = vadd.f32 %v1366_v27, %v1288_v25 }
 0x69f   :  { %v1377_v8 = vadd.f32 %v2208_v58, %v1370_v60  ;;  %v2234_v61 = vpop.eup %2233 }
 0x6a1   :  { %2235 = vtanh.f32 %v1377_v8 }
 0x6a7   :  { %v2236_v62 = vpop.eup %2235 }
 0x6a8   :  { %v1380_v63 = vpack.c.bf16 %v2236_v62, %v2234_v61 }
 0x6aa   :  { %1394 = vxpose.xlu0.c.b16.start.end [1/1] (short) %v1380_v63, 128 }
 0x756   :  { %v1402_v1 = vpop.trf.xlu0 }
 0x757   :  { %2052 = vmatmul.msk.bf16.vlgmr.msrb.gmra.mxu3 %vm149_vm0, %v1402_v1  ;;  %2062 = vmatmul.msk.bf16.vlgmr.msra.gmra.mxu0 %vm149_vm0, %v1402_v1 }
 0x766   :  { %v1403_v3 = vpop.trf.xlu0 }
 0x767   :  { %2053 = vmatmul.msk.bf16.gmra.mxu3 %vm149_vm0, %v1403_v3  ;;  %2063 = vmatmul.msk.bf16.gmra.mxu0 %vm149_vm0, %v1403_v3 }
 0x776   :  { %v1404_v4 = vpop.trf.xlu0 }
 0x777   :  { %2054 = vmatmul.msk.bf16.gmra.mxu3 %vm149_vm0, %v1404_v4  ;;  %2064 = vmatmul.msk.bf16.gmra.mxu0 %vm149_vm0, %v1404_v4 }
 0x786   :  { %v1405_v6 = vpop.trf.xlu0 }
 0x787   :  { %2055 = vmatmul.msk.bf16.gmra.mxu3 %vm149_vm0, %v1405_v6  ;;  %2065 = vmatmul.msk.bf16.gmra.mxu0 %vm149_vm0, %v1405_v6 }
 0x796   :  { %v1406_v7 = vpop.trf.xlu0 }
 0x797   :  { %2056 = vmatmul.msk.bf16.gmra.mxu3 %vm149_vm0, %v1406_v7  ;;  %2066 = vmatmul.msk.bf16.vlgmr.msrb.gmra.mxu1 %vm149_vm0, %v1406_v7 }
 0x7a6   :  { %v1407_v9 = vpop.trf.xlu0 }
 0x7a7   :  { %2057 = vmatmul.msk.bf16.gmra.mxu3 %vm149_vm0, %v1407_v9  ;;  %2067 = vmatmul.msk.bf16.gmra.mxu1 %vm149_vm0, %v1407_v9 }
 0x7b6   :  { %v1408_v12 = vpop.trf.xlu0 }
 0x7b7   :  { %2058 = vmatmul.msk.bf16.gmra.mxu3 %vm149_vm0, %v1408_v12  ;;  %2068 = vmatmul.msk.bf16.gmra.mxu1 %vm149_vm0, %v1408_v12 }
 0x7c6   :  { %v1409_v13 = vpop.trf.xlu0 }
 0x7c7   :  { %2059 = vmatmul.msk.bf16.gmra.mxu3 %vm149_vm0, %v1409_v13  ;;  %2069 = vmatmul.msk.bf16.gmra.mxu1 %vm149_vm0, %v1409_v13 }
 0x7d4   :  { %v1492_v14 = vpop.f32.mrf.mxu0 }
 0x7da   :  { %v1443_v15 = vpop.f32.mrf.mxu3 }
 0x7db   :  { %v1532_v17 = vmul.f32 %v1492_v14, %v1443_v15 }
 0x7dc   :  { %v1494_v11 = vpop.f32.mrf.mxu0 }
 0x7e2   :  { %v1445_v16 = vpop.f32.mrf.mxu3 }
 0x7e3   :  { %v1533_v18 = vmul.f32 %v1494_v11, %v1445_v16 }
 0x7e4   :  { %v1497_v20 = vpop.f32.mrf.mxu0 }
 0x7e5   :  { %v1548_v19 = vadd.f32 %v1533_v18, %v1532_v17 }
 0x7ea   :  { %v1448_v32 = vpop.f32.mrf.mxu3 }
 0x7eb   :  { %v1534_v21 = vmul.f32 %v1497_v20, %v1448_v32 }
 0x7ec   :  { %v1499_v22 = vpop.f32.mrf.mxu0 }
 0x7ed   :  { %v1549_v5 = vadd.f32 %v1548_v19, %v1534_v21 }
 0x7f2   :  { %v1450_v23 = vpop.f32.mrf.mxu3 }
 0x7f3   :  { %v1535_v24 = vmul.f32 %v1499_v22, %v1450_v23 }
 0x7f4   :  { %v1502_v53 = vpop.f32.mrf.mxu0 }
 0x7f5   :  { %v1550_v26 = vadd.f32 %v1549_v5, %v1535_v24 }
 0x7fa   :  { %v1453_v54 = vpop.f32.mrf.mxu3 }
 0x7fb   :  { %v1536_v28 = vmul.f32 %v1502_v53, %v1453_v54 }
 0x7fc   :  { %v1504_v42 = vpop.f32.mrf.mxu0 }
 0x7fd   :  { %v1551_v29 = vadd.f32 %v1550_v26, %v1536_v28 }
 0x802   :  { %v1455_v30 = vpop.f32.mrf.mxu3 }
 0x803   :  { %v1537_v46 = vmul.f32 %v1504_v42, %v1455_v30 }
 0x804   :  { %v1507_v44 = vpop.f32.mrf.mxu0 }
 0x805   :  { %v1552_v38 = vadd.f32 %v1551_v29, %v1537_v46 }
 0x80a   :  { %v1458_v33 = vpop.f32.mrf.mxu3 }
 0x80b   :  { %v1538_v48 = vmul.f32 %v1507_v44, %v1458_v33 }
 0x80c   :  { %v1509_v49 = vpop.f32.mrf.mxu0 }
 0x80d   :  { %v1553_v52 = vadd.f32 %v1552_v38, %v1538_v48 }
 0x812   :  { %v1460_v34 = vpop.f32.mrf.mxu3 }
 0x813   :  { %v1539_v41 = vmul.f32 %v1509_v49, %v1460_v34 }
 0x814   :  { %v1512_v35 = vpop.f32.mrf.mxu1 }
 0x815   :  { %v1554_v31 = vadd.f32 %v1553_v52, %v1539_v41 }
 0x81a   :  { %v1463_v36 = vpop.f32.mrf.mxu3 }
 0x81b   :  { %v1540_v55 = vmul.f32 %v1512_v35, %v1463_v36 }
 0x81c   :  { %v1514_v37 = vpop.f32.mrf.mxu1 }
 0x81d   :  { %v1555_v57 = vadd.f32 %v1554_v31, %v1540_v55 }
 0x822   :  { %v1465_v0 = vpop.f32.mrf.mxu3 }
 0x823   :  { %v1541_v56 = vmul.f32 %v1514_v37, %v1465_v0 }
 0x824   :  { %v1517_v39 = vpop.f32.mrf.mxu1 }
 0x825   :  { %v1556_v25 = vadd.f32 %v1555_v57, %v1541_v56 }
 0x82a   :  { %v1468_v40 = vpop.f32.mrf.mxu3 }
 0x82b   :  { %v1542_v58 = vmul.f32 %v1517_v39, %v1468_v40 }
 0x82c   :  { %v1519_v2 = vpop.f32.mrf.mxu1 }
 0x82d   :  { %v1557_v60 = vadd.f32 %v1556_v25, %v1542_v58 }
 0x832   :  { %v1470_v10 = vpop.f32.mrf.mxu3 }
 0x833   :  { %v1543_v27 = vmul.f32 %v1519_v2, %v1470_v10 }
 0x834   :  { %v1522_v43 = vpop.f32.mrf.mxu1 }
 0x835   :  { %v1558_v61 = vadd.f32 %v1557_v60, %v1543_v27 }
 0x83a   :  { %v1473_v45 = vpop.f32.mrf.mxu3 }
 0x83b   :  { %v1544_v8 = vmul.f32 %v1522_v43, %v1473_v45 }
 0x83c   :  { %v1524_v47 = vpop.f32.mrf.mxu1 }
 0x83d   :  { %v1559_v63 = vadd.f32 %v1558_v61, %v1544_v8 }
 0x842   :  { %v1475_v51 = vpop.f32.mrf.mxu3 }
 0x843   :  { %v1545_v62 = vmul.f32 %v1524_v47, %v1475_v51 }
 0x844   :  { %v1527_v59 = vpop.f32.mrf.mxu1 }
 0x845   :  { %v1560_v3 = vadd.f32 %v1559_v63, %v1545_v62 }
 0x84a   :  { %v1478_v50 = vpop.f32.mrf.mxu3 }
 0x84b   :  { %v1546_v1 = vmul.f32 %v1527_v59, %v1478_v50 }
 0x84c   :  { %v1529_v4 = vpop.f32.mrf.mxu1 }
 0x84d   :  { %v1561_v7 = vadd.f32 %v1560_v3, %v1546_v1 }
 0x852   :  { %v1480_v6 = vpop.f32.mrf.mxu3 }
 0x853   :  { %v1547_v9 = vmul.f32 %v1529_v4, %v1480_v6 }
 0x855   :  { %v1562_v12 = vadd.f32 %v1561_v7, %v1547_v9 }
 0x857   :  { %v1563_v13 = vrot.slane %v1562_v12, 4 }
 0x859   :  { %v1564_v14 = vadd.f32 %v1563_v13, %v1562_v12 }
 0x85b   :  { %v1565_v15 = vrot.slane %v1564_v14, 2 }
 0x85d   :  { %v1566_v11 = vadd.f32 %v1565_v15, %v1564_v14 }
 0x85f   :  { %v1567_v16 = vrot.slane %v1566_v11, 1 }
 0x861   :  { %v1568_v17 = vadd.f32 %v1567_v16, %v1566_v11 }
 0x863   :  { %1569 = vst [vmem:[#allocation13] sm:$0x1] %v1568_v17 }
 0x864   :  { %1580 = dma.vmem_to_hbm [thread:$0]  %s1576_s20, 16, %s1578_s23, [#allocation4]  }
 0x865   :  { %2413 = dma.done.wait [#allocation4], 16  }
 0x866   :  { %2414 = vsyncadd [#allocation4], 4294967280 }
 0x867   :  { %1585 = vsyncpa [#allocation3], 1 }
 0x868   :  { %1586 = vsyncpa [#allocation6], 1 }
 0x869   :  { %1587 = vsyncpa [#allocation9], 1 }
 0x86a   :  { %1588 = vsyncpa [#allocation12], 1 }
 0x86b   :  { %1589 = vsyncpa [#allocation4], 1 }

</bundles_post_ra>
